<compile_context>
chip_gen: v7x
topology: tpu7x:2x2x1
jax: 0.10.0
libtpu: 0.0.40
codegen_flags: <defaults>
</compile_context>

<pallas_src>
import functools

import jax
import jax.numpy as jnp
from jax import lax
from jax.experimental import pallas as pl
from jax.experimental.pallas import tpu as pltpu  # noqa: F401  (TPU backend)

EMBED_DIM = 32          # args.decoder_embed_dim
FFN_DIM = 64            # args.decoder_ffn_embed_dim
NUM_HEADS = 4           # args.decoder_attention_heads
HEAD_DIM = EMBED_DIM // NUM_HEADS
EPS = 1e-5


# ------------------------------ in-kernel helpers ---------------------------

def _layernorm(y, g, b):
    # nn.LayerNorm(eps=1e-5, elementwise_affine=True), f32 math
    mu = jnp.mean(y, axis=-1, keepdims=True)
    var = jnp.mean(jnp.square(y - mu), axis=-1, keepdims=True)
    return (y - mu) * lax.rsqrt(var + EPS) * g + b


def _softmax_lastdim(s):
    m = jnp.max(s, axis=-1, keepdims=True)
    e = jnp.exp(s - m)
    return e * pl.reciprocal(jnp.sum(e, axis=-1, keepdims=True), approx=True)


# ------------------------------ fused layer kernel ---------------------------

def _decoder_layer_kernel(
        x_ref, enc_ref,
        sa_qkv_w_ref, sa_qkv_b_ref, sa_out_w_ref, sa_out_b_ref,
        sa_ln_g_ref, sa_ln_b_ref,
        ea_q_w_ref, ea_q_b_ref, ea_kv_w_ref, ea_kv_b_ref,
        ea_out_w_ref, ea_out_b_ref, ea_ln_g_ref, ea_ln_b_ref,
        fc1_w_ref, fc1_b_ref, fc2_w_ref, fc2_b_ref,
        fin_ln_g_ref, fin_ln_b_ref,
        out_ref, attn_ref,
        *, B, T, S, H, scale):
    C = x_ref.shape[-1]
    dh = C // H

    x = x_ref[...].astype(jnp.float32)      # (B*T, C), batch-major rows
    enc = enc_ref[...].astype(jnp.float32)  # (B*S, C)

    # ----------------- self-attention block (post-norm) -----------------
    qkv = (jnp.dot(x, sa_qkv_w_ref[...], preferred_element_type=jnp.float32)
           + sa_qkv_b_ref[...])                       # (B*T, 3C)
    q = qkv[:, 0 * C:1 * C] * scale                   # fairseq: q *= head_dim**-0.5
    k = qkv[:, 1 * C:2 * C]
    v = qkv[:, 2 * C:3 * C]

    sa_out_w = sa_out_w_ref[...]                      # (C, C), pre-transposed (in,out)
    sa = sa_out_b_ref[...]                            # (1, C) broadcasts to (B*T, C)
    for h in range(H):                                # static unroll, H is tiny
        cs = slice(h * dh, (h + 1) * dh)
        qh = q[:, cs].reshape(B, T, dh)
        kh = k[:, cs].reshape(B, T, dh)
        vh = v[:, cs].reshape(B, T, dh)
        s = jnp.einsum('bqd,bkd->bqk', qh, kh, preferred_element_type=jnp.float32)
        p = _softmax_lastdim(s)                       # self-attn probs never stored
        oh = jnp.einsum('bqk,bkd->bqd', p, vh, preferred_element_type=jnp.float32)
        # out-projection fused into the head loop:
        #   concat_h(o_h) @ W  ==  sum_h  o_h @ W[h*dh:(h+1)*dh, :]
        sa = sa + jnp.dot(oh.reshape(B * T, dh), sa_out_w[cs, :],
                          preferred_element_type=jnp.float32)

    x1 = _layernorm(x + sa, sa_ln_g_ref[...], sa_ln_b_ref[...])

    # ----------------- encoder (cross) attention block -----------------
    q2 = (jnp.dot(x1, ea_q_w_ref[...], preferred_element_type=jnp.float32)
          + ea_q_b_ref[...]) * scale                  # (B*T, C)
    kv = (jnp.dot(enc, ea_kv_w_ref[...], preferred_element_type=jnp.float32)
          + ea_kv_b_ref[...])                         # (B*S, 2C)
    k2 = kv[:, 0 * C:1 * C]
    v2 = kv[:, 1 * C:2 * C]

    ea_out_w = ea_out_w_ref[...]
    ca = ea_out_b_ref[...]
    p_sum = jnp.zeros((B, T, S), jnp.float32)
    for h in range(H):
        cs = slice(h * dh, (h + 1) * dh)
        qh = q2[:, cs].reshape(B, T, dh)
        kh = k2[:, cs].reshape(B, S, dh)
        vh = v2[:, cs].reshape(B, S, dh)
        s = jnp.einsum('bqd,bkd->bqk', qh, kh, preferred_element_type=jnp.float32)
        p = _softmax_lastdim(s)
        p_sum = p_sum + p                             # head-mean computed in-kernel
        oh = jnp.einsum('bqk,bkd->bqd', p, vh, preferred_element_type=jnp.float32)
        ca = ca + jnp.dot(oh.reshape(B * T, dh), ea_out_w[cs, :],
                          preferred_element_type=jnp.float32)

    x2 = _layernorm(x1 + ca, ea_ln_g_ref[...], ea_ln_b_ref[...])
    attn_ref[...] = (p_sum * (1.0 / H)).astype(attn_ref.dtype)

    # ----------------- feed-forward block -----------------
    hdn = jnp.maximum(
        jnp.dot(x2, fc1_w_ref[...], preferred_element_type=jnp.float32) + fc1_b_ref[...],
        0.0)                                          # activation_fn = F.relu
    y = jnp.dot(hdn, fc2_w_ref[...], preferred_element_type=jnp.float32) + fc2_b_ref[...]
    out_ref[...] = _layernorm(x2 + y, fin_ln_g_ref[...], fin_ln_b_ref[...]).astype(out_ref.dtype)


# ------------------------------ wrapper --------------------------------------

@jax.jit
def transformer_decoder_layer(x, encoder_out, params):
    """Eval-mode forward; dropout = identity, masks/incremental_state = None.
    Returns (x, attn, None) like the PyTorch module."""
    # TODO(synk): incremental_state / prev_*_attn_state KV caching and the
    # self_attn_mask / padding-mask branches are not implemented (None path).
    T, B, C = x.shape
    S = encoder_out.shape[0]
    H = NUM_HEADS
    scale = (C // H) ** -0.5

    # batch-major 2-D views for the fused kernel (lane dim = C)
    xb = jnp.transpose(x, (1, 0, 2)).reshape(B * T, C)
    encb = jnp.transpose(encoder_out, (1, 0, 2)).reshape(B * S, C)

    sa_p = params['self_attn']
    ea_p = params['encoder_attn']

    # one-time weight prep (pre-transposed to (in, out); fused QKV / KV)
    sa_qkv_w = jnp.concatenate([sa_p['q_w'], sa_p['k_w'], sa_p['v_w']], axis=0).T  # (C, 3C)
    sa_qkv_b = jnp.concatenate([sa_p['q_b'], sa_p['k_b'], sa_p['v_b']]).reshape(1, 3 * C)
    sa_out_w = sa_p['out_w'].T
    sa_out_b = sa_p['out_b'].reshape(1, C)
    ea_q_w = ea_p['q_w'].T
    ea_q_b = ea_p['q_b'].reshape(1, C)
    ea_kv_w = jnp.concatenate([ea_p['k_w'], ea_p['v_w']], axis=0).T               # (C, 2C)
    ea_kv_b = jnp.concatenate([ea_p['k_b'], ea_p['v_b']]).reshape(1, 2 * C)
    ea_out_w = ea_p['out_w'].T
    ea_out_b = ea_p['out_b'].reshape(1, C)
    fc1_w = params['fc1_w'].T
    fc1_b = params['fc1_b'].reshape(1, -1)
    fc2_w = params['fc2_w'].T
    fc2_b = params['fc2_b'].reshape(1, -1)

    out2d, attn = pl.pallas_call(
        functools.partial(_decoder_layer_kernel, B=B, T=T, S=S, H=H, scale=scale),
        out_shape=(jax.ShapeDtypeStruct((B * T, C), x.dtype),
                   jax.ShapeDtypeStruct((B, T, S), jnp.float32)),
    )(
        xb, encb,
        sa_qkv_w, sa_qkv_b, sa_out_w, sa_out_b,
        params['self_attn_ln_g'].reshape(1, C), params['self_attn_ln_b'].reshape(1, C),
        ea_q_w, ea_q_b, ea_kv_w, ea_kv_b, ea_out_w, ea_out_b,
        params['encoder_attn_ln_g'].reshape(1, C), params['encoder_attn_ln_b'].reshape(1, C),
        fc1_w, fc1_b, fc2_w, fc2_b,
        params['final_ln_g'].reshape(1, C), params['final_ln_b'].reshape(1, C),
    )

    out = out2d.reshape(B, T, C).transpose(1, 0, 2)   # back to (T, B, C)
    return out, attn, None


# ------------------------------ parameter init --------------------------------

def init_params(key):
    keys = iter(jax.random.split(key, 32))

    def w(shape, scale=0.02):
        return (scale * jax.random.normal(next(keys), shape)).astype(jnp.float32)

    def mha(kdim=EMBED_DIM):
        return {
            'q_w': w((EMBED_DIM, EMBED_DIM)), 'q_b': w((EMBED_DIM,)),
            'k_w': w((EMBED_DIM, kdim)),      'k_b': w((EMBED_DIM,)),
            'v_w': w((EMBED_DIM, kdim)),      'v_b': w((EMBED_DIM,)),
            'out_w': w((EMBED_DIM, EMBED_DIM)), 'out_b': w((EMBED_DIM,)),
        }

    return {
        'self_attn': mha(),
        'encoder_attn': mha(kdim=EMBED_DIM),  # encoder_embed_dim == decoder_embed_dim
        'self_attn_ln_g': jnp.ones((EMBED_DIM,), jnp.float32),
        'self_attn_ln_b': jnp.zeros((EMBED_DIM,), jnp.float32),
        'encoder_attn_ln_g': jnp.ones((EMBED_DIM,), jnp.float32),
        'encoder_attn_ln_b': jnp.zeros((EMBED_DIM,), jnp.float32),
        'final_ln_g': jnp.ones((EMBED_DIM,), jnp.float32),
        'final_ln_b': jnp.zeros((EMBED_DIM,), jnp.float32),
        'fc1_w': w((FFN_DIM, EMBED_DIM)), 'fc1_b': w((FFN_DIM,)),
        'fc2_w': w((EMBED_DIM, FFN_DIM)), 'fc2_b': w((EMBED_DIM,)),
    }


if __name__ == "__main__":
    key = jax.random.PRNGKey(0)
    kx, ke, kp = jax.random.split(key, 3)

    T, B, S = 8, 2, 8
    x = jax.random.normal(kx, (T, B, EMBED_DIM), jnp.float32)
    encoder_out = jax.random.normal(ke, (S, B, EMBED_DIM), jnp.float32)
    params = init_params(kp)

    out, attn, _ = transformer_decoder_layer(x, encoder_out, params)
    out = jax.block_until_ready(out)
    attn = jax.block_until_ready(attn)

    assert out.shape == (T, B, EMBED_DIM)
    assert attn.shape == (B, T, S)
    assert jnp.all(jnp.isfinite(out)) and jnp.all(jnp.isfinite(attn))
    # attention rows should sum to ~1 (softmax, head-averaged)
    assert jnp.allclose(jnp.sum(attn, axis=-1), 1.0, atol=1e-2)
    print("KERNEL_OK")
</pallas_src>

<mosaic_0001>
module attributes {stable_mosaic.version = 11 : i64} {
  func.func @_decoder_layer_kernel(%arg0: memref<16x32xf32, #tpu.memory_space<vmem>>, %arg1: memref<16x32xf32, #tpu.memory_space<vmem>>, %arg2: memref<32x96xf32, #tpu.memory_space<vmem>>, %arg3: memref<1x96xf32, #tpu.memory_space<vmem>>, %arg4: memref<32x32xf32, #tpu.memory_space<vmem>>, %arg5: memref<1x32xf32, #tpu.memory_space<vmem>>, %arg6: memref<1x32xf32, #tpu.memory_space<vmem>>, %arg7: memref<1x32xf32, #tpu.memory_space<vmem>>, %arg8: memref<32x32xf32, #tpu.memory_space<vmem>>, %arg9: memref<1x32xf32, #tpu.memory_space<vmem>>, %arg10: memref<32x64xf32, #tpu.memory_space<vmem>>, %arg11: memref<1x64xf32, #tpu.memory_space<vmem>>, %arg12: memref<32x32xf32, #tpu.memory_space<vmem>>, %arg13: memref<1x32xf32, #tpu.memory_space<vmem>>, %arg14: memref<1x32xf32, #tpu.memory_space<vmem>>, %arg15: memref<1x32xf32, #tpu.memory_space<vmem>>, %arg16: memref<32x64xf32, #tpu.memory_space<vmem>>, %arg17: memref<1x64xf32, #tpu.memory_space<vmem>>, %arg18: memref<64x32xf32, #tpu.memory_space<vmem>>, %arg19: memref<1x32xf32, #tpu.memory_space<vmem>>, %arg20: memref<1x32xf32, #tpu.memory_space<vmem>>, %arg21: memref<1x32xf32, #tpu.memory_space<vmem>>, %arg22: memref<16x32xf32, #tpu.memory_space<vmem>>, %arg23: memref<2x8x8xf32, #tpu.memory_space<vmem>>) attributes {dimension_semantics = [], scalar_prefetch = 0 : i64, scratch_operands = 0 : i64, tpu.core_type = #tpu.core_type<tc>} {
    %c0 = arith.constant 0 : index
    %c0_0 = arith.constant 0 : index
    %0 = vector.load %arg0[%c0, %c0_0] : memref<16x32xf32, #tpu.memory_space<vmem>>, vector<16x32xf32>
    %c0_1 = arith.constant 0 : index
    %c0_2 = arith.constant 0 : index
    %1 = vector.load %arg1[%c0_1, %c0_2] : memref<16x32xf32, #tpu.memory_space<vmem>>, vector<16x32xf32>
    %c0_3 = arith.constant 0 : index
    %c0_4 = arith.constant 0 : index
    %2 = vector.load %arg2[%c0_3, %c0_4] : memref<32x96xf32, #tpu.memory_space<vmem>>, vector<32x96xf32>
    %cst = arith.constant dense<0.000000e+00> : vector<16x96xf32>
    %3 = tpu.matmul %0, %2, %cst {dimension_numbers = #tpu.dot_dimension_numbers<[1], [0], [0], [1], [0, 0, 1, 1], [], []>} : vector<16x32xf32>, vector<32x96xf32>, vector<16x96xf32> -> vector<16x96xf32>
    %c0_5 = arith.constant 0 : index
    %c0_6 = arith.constant 0 : index
    %4 = vector.load %arg3[%c0_5, %c0_6] : memref<1x96xf32, #tpu.memory_space<vmem>>, vector<1x96xf32>
    %5 = vector.broadcast %4 : vector<1x96xf32> to vector<16x96xf32>
    %6 = arith.addf %3, %5 : vector<16x96xf32>
    %7 = vector.extract_strided_slice %6 {offsets = [0, 0], sizes = [16, 32], strides = [1, 1]} : vector<16x96xf32> to vector<16x32xf32>
    %cst_7 = arith.constant 0.353553385 : f32
    %8 = vector.broadcast %cst_7 : f32 to vector<16x32xf32>
    %9 = arith.mulf %7, %8 : vector<16x32xf32>
    %10 = vector.extract_strided_slice %6 {offsets = [0, 32], sizes = [16, 32], strides = [1, 1]} : vector<16x96xf32> to vector<16x32xf32>
    %11 = vector.extract_strided_slice %6 {offsets = [0, 64], sizes = [16, 32], strides = [1, 1]} : vector<16x96xf32> to vector<16x32xf32>
    %c0_8 = arith.constant 0 : index
    %c0_9 = arith.constant 0 : index
    %12 = vector.load %arg4[%c0_8, %c0_9] : memref<32x32xf32, #tpu.memory_space<vmem>>, vector<32x32xf32>
    %c0_10 = arith.constant 0 : index
    %c0_11 = arith.constant 0 : index
    %13 = vector.load %arg5[%c0_10, %c0_11] : memref<1x32xf32, #tpu.memory_space<vmem>>, vector<1x32xf32>
    %14 = vector.extract_strided_slice %9 {offsets = [0, 0], sizes = [16, 8], strides = [1, 1]} : vector<16x32xf32> to vector<16x8xf32>
    %15 = vector.shape_cast %14 : vector<16x8xf32> to vector<2x8x8xf32>
    %16 = vector.extract_strided_slice %10 {offsets = [0, 0], sizes = [16, 8], strides = [1, 1]} : vector<16x32xf32> to vector<16x8xf32>
    %17 = vector.shape_cast %16 : vector<16x8xf32> to vector<2x8x8xf32>
    %18 = vector.extract_strided_slice %11 {offsets = [0, 0], sizes = [16, 8], strides = [1, 1]} : vector<16x32xf32> to vector<16x8xf32>
    %19 = vector.shape_cast %18 : vector<16x8xf32> to vector<2x8x8xf32>
    "tpu.trace_start"() <{level = 10 : i32, message = "bqd,bkd->bqk"}> : () -> ()
    %cst_12 = arith.constant dense<0.000000e+00> : vector<2x8x8xf32>
    %20 = tpu.matmul %15, %17, %cst_12 {dimension_numbers = #tpu.dot_dimension_numbers<[2], [2], [1], [1], [0, 0, 0, 1, 1, 1], [0], [0]>} : vector<2x8x8xf32>, vector<2x8x8xf32>, vector<2x8x8xf32> -> vector<2x8x8xf32>
    "tpu.trace_stop"() : () -> ()
    %cst_13 = arith.constant dense<0xFF800000> : vector<2x8xf32>
    %21 = vector.multi_reduction <maximumf>, %20, %cst_13 [2] : vector<2x8x8xf32> to vector<2x8xf32>
    %22 = vector.shape_cast %21 : vector<2x8xf32> to vector<2x8x1xf32>
    %23 = vector.broadcast %22 : vector<2x8x1xf32> to vector<2x8x8xf32>
    %24 = arith.subf %20, %23 : vector<2x8x8xf32>
    %25 = math.exp %24 : vector<2x8x8xf32>
    %cst_14 = arith.constant dense<0.000000e+00> : vector<2x8xf32>
    %26 = vector.multi_reduction <add>, %25, %cst_14 [2] : vector<2x8x8xf32> to vector<2x8xf32>
    %27 = vector.shape_cast %26 : vector<2x8xf32> to vector<2x8x1xf32>
    %28 = tpu.reciprocal %27 {approx = true} : vector<2x8x1xf32> -> vector<2x8x1xf32>
    %29 = vector.broadcast %28 : vector<2x8x1xf32> to vector<2x8x8xf32>
    %30 = arith.mulf %25, %29 : vector<2x8x8xf32>
    "tpu.trace_start"() <{level = 10 : i32, message = "bqk,bkd->bqd"}> : () -> ()
    %cst_15 = arith.constant dense<0.000000e+00> : vector<2x8x8xf32>
    %31 = tpu.matmul %30, %19, %cst_15 {dimension_numbers = #tpu.dot_dimension_numbers<[2], [1], [1], [2], [0, 0, 0, 1, 1, 2], [0], [0]>} : vector<2x8x8xf32>, vector<2x8x8xf32>, vector<2x8x8xf32> -> vector<2x8x8xf32>
    "tpu.trace_stop"() : () -> ()
    %32 = vector.shape_cast %31 : vector<2x8x8xf32> to vector<16x8xf32>
    %33 = vector.extract_strided_slice %12 {offsets = [0, 0], sizes = [8, 32], strides = [1, 1]} : vector<32x32xf32> to vector<8x32xf32>
    %cst_16 = arith.constant dense<0.000000e+00> : vector<16x32xf32>
    %34 = tpu.matmul %32, %33, %cst_16 {dimension_numbers = #tpu.dot_dimension_numbers<[1], [0], [0], [1], [0, 0, 1, 1], [], []>} : vector<16x8xf32>, vector<8x32xf32>, vector<16x32xf32> -> vector<16x32xf32>
    %35 = vector.broadcast %13 : vector<1x32xf32> to vector<16x32xf32>
    %36 = arith.addf %35, %34 : vector<16x32xf32>
    %37 = vector.extract_strided_slice %9 {offsets = [0, 8], sizes = [16, 8], strides = [1, 1]} : vector<16x32xf32> to vector<16x8xf32>
    %38 = vector.shape_cast %37 : vector<16x8xf32> to vector<2x8x8xf32>
    %39 = vector.extract_strided_slice %10 {offsets = [0, 8], sizes = [16, 8], strides = [1, 1]} : vector<16x32xf32> to vector<16x8xf32>
    %40 = vector.shape_cast %39 : vector<16x8xf32> to vector<2x8x8xf32>
    %41 = vector.extract_strided_slice %11 {offsets = [0, 8], sizes = [16, 8], strides = [1, 1]} : vector<16x32xf32> to vector<16x8xf32>
    %42 = vector.shape_cast %41 : vector<16x8xf32> to vector<2x8x8xf32>
    "tpu.trace_start"() <{level = 10 : i32, message = "bqd,bkd->bqk"}> : () -> ()
    %cst_17 = arith.constant dense<0.000000e+00> : vector<2x8x8xf32>
    %43 = tpu.matmul %38, %40, %cst_17 {dimension_numbers = #tpu.dot_dimension_numbers<[2], [2], [1], [1], [0, 0, 0, 1, 1, 1], [0], [0]>} : vector<2x8x8xf32>, vector<2x8x8xf32>, vector<2x8x8xf32> -> vector<2x8x8xf32>
    "tpu.trace_stop"() : () -> ()
    %cst_18 = arith.constant dense<0xFF800000> : vector<2x8xf32>
    %44 = vector.multi_reduction <maximumf>, %43, %cst_18 [2] : vector<2x8x8xf32> to vector<2x8xf32>
    %45 = vector.shape_cast %44 : vector<2x8xf32> to vector<2x8x1xf32>
    %46 = vector.broadcast %45 : vector<2x8x1xf32> to vector<2x8x8xf32>
    %47 = arith.subf %43, %46 : vector<2x8x8xf32>
    %48 = math.exp %47 : vector<2x8x8xf32>
    %cst_19 = arith.constant dense<0.000000e+00> : vector<2x8xf32>
    %49 = vector.multi_reduction <add>, %48, %cst_19 [2] : vector<2x8x8xf32> to vector<2x8xf32>
    %50 = vector.shape_cast %49 : vector<2x8xf32> to vector<2x8x1xf32>
    %51 = tpu.reciprocal %50 {approx = true} : vector<2x8x1xf32> -> vector<2x8x1xf32>
    %52 = vector.broadcast %51 : vector<2x8x1xf32> to vector<2x8x8xf32>
    %53 = arith.mulf %48, %52 : vector<2x8x8xf32>
    "tpu.trace_start"() <{level = 10 : i32, message = "bqk,bkd->bqd"}> : () -> ()
    %cst_20 = arith.constant dense<0.000000e+00> : vector<2x8x8xf32>
    %54 = tpu.matmul %53, %42, %cst_20 {dimension_numbers = #tpu.dot_dimension_numbers<[2], [1], [1], [2], [0, 0, 0, 1, 1, 2], [0], [0]>} : vector<2x8x8xf32>, vector<2x8x8xf32>, vector<2x8x8xf32> -> vector<2x8x8xf32>
    "tpu.trace_stop"() : () -> ()
    %55 = vector.shape_cast %54 : vector<2x8x8xf32> to vector<16x8xf32>
    %56 = vector.extract_strided_slice %12 {offsets = [8, 0], sizes = [8, 32], strides = [1, 1]} : vector<32x32xf32> to vector<8x32xf32>
    %cst_21 = arith.constant dense<0.000000e+00> : vector<16x32xf32>
    %57 = tpu.matmul %55, %56, %cst_21 {dimension_numbers = #tpu.dot_dimension_numbers<[1], [0], [0], [1], [0, 0, 1, 1], [], []>} : vector<16x8xf32>, vector<8x32xf32>, vector<16x32xf32> -> vector<16x32xf32>
    %58 = arith.addf %36, %57 : vector<16x32xf32>
    %59 = vector.extract_strided_slice %9 {offsets = [0, 16], sizes = [16, 8], strides = [1, 1]} : vector<16x32xf32> to vector<16x8xf32>
    %60 = vector.shape_cast %59 : vector<16x8xf32> to vector<2x8x8xf32>
    %61 = vector.extract_strided_slice %10 {offsets = [0, 16], sizes = [16, 8], strides = [1, 1]} : vector<16x32xf32> to vector<16x8xf32>
    %62 = vector.shape_cast %61 : vector<16x8xf32> to vector<2x8x8xf32>
    %63 = vector.extract_strided_slice %11 {offsets = [0, 16], sizes = [16, 8], strides = [1, 1]} : vector<16x32xf32> to vector<16x8xf32>
    %64 = vector.shape_cast %63 : vector<16x8xf32> to vector<2x8x8xf32>
    "tpu.trace_start"() <{level = 10 : i32, message = "bqd,bkd->bqk"}> : () -> ()
    %cst_22 = arith.constant dense<0.000000e+00> : vector<2x8x8xf32>
    %65 = tpu.matmul %60, %62, %cst_22 {dimension_numbers = #tpu.dot_dimension_numbers<[2], [2], [1], [1], [0, 0, 0, 1, 1, 1], [0], [0]>} : vector<2x8x8xf32>, vector<2x8x8xf32>, vector<2x8x8xf32> -> vector<2x8x8xf32>
    "tpu.trace_stop"() : () -> ()
    %cst_23 = arith.constant dense<0xFF800000> : vector<2x8xf32>
    %66 = vector.multi_reduction <maximumf>, %65, %cst_23 [2] : vector<2x8x8xf32> to vector<2x8xf32>
    %67 = vector.shape_cast %66 : vector<2x8xf32> to vector<2x8x1xf32>
    %68 = vector.broadcast %67 : vector<2x8x1xf32> to vector<2x8x8xf32>
    %69 = arith.subf %65, %68 : vector<2x8x8xf32>
    %70 = math.exp %69 : vector<2x8x8xf32>
    %cst_24 = arith.constant dense<0.000000e+00> : vector<2x8xf32>
    %71 = vector.multi_reduction <add>, %70, %cst_24 [2] : vector<2x8x8xf32> to vector<2x8xf32>
    %72 = vector.shape_cast %71 : vector<2x8xf32> to vector<2x8x1xf32>
    %73 = tpu.reciprocal %72 {approx = true} : vector<2x8x1xf32> -> vector<2x8x1xf32>
    %74 = vector.broadcast %73 : vector<2x8x1xf32> to vector<2x8x8xf32>
    %75 = arith.mulf %70, %74 : vector<2x8x8xf32>
    "tpu.trace_start"() <{level = 10 : i32, message = "bqk,bkd->bqd"}> : () -> ()
    %cst_25 = arith.constant dense<0.000000e+00> : vector<2x8x8xf32>
    %76 = tpu.matmul %75, %64, %cst_25 {dimension_numbers = #tpu.dot_dimension_numbers<[2], [1], [1], [2], [0, 0, 0, 1, 1, 2], [0], [0]>} : vector<2x8x8xf32>, vector<2x8x8xf32>, vector<2x8x8xf32> -> vector<2x8x8xf32>
    "tpu.trace_stop"() : () -> ()
    %77 = vector.shape_cast %76 : vector<2x8x8xf32> to vector<16x8xf32>
    %78 = vector.extract_strided_slice %12 {offsets = [16, 0], sizes = [8, 32], strides = [1, 1]} : vector<32x32xf32> to vector<8x32xf32>
    %cst_26 = arith.constant dense<0.000000e+00> : vector<16x32xf32>
    %79 = tpu.matmul %77, %78, %cst_26 {dimension_numbers = #tpu.dot_dimension_numbers<[1], [0], [0], [1], [0, 0, 1, 1], [], []>} : vector<16x8xf32>, vector<8x32xf32>, vector<16x32xf32> -> vector<16x32xf32>
    %80 = arith.addf %58, %79 : vector<16x32xf32>
    %81 = vector.extract_strided_slice %9 {offsets = [0, 24], sizes = [16, 8], strides = [1, 1]} : vector<16x32xf32> to vector<16x8xf32>
    %82 = vector.shape_cast %81 : vector<16x8xf32> to vector<2x8x8xf32>
    %83 = vector.extract_strided_slice %10 {offsets = [0, 24], sizes = [16, 8], strides = [1, 1]} : vector<16x32xf32> to vector<16x8xf32>
    %84 = vector.shape_cast %83 : vector<16x8xf32> to vector<2x8x8xf32>
    %85 = vector.extract_strided_slice %11 {offsets = [0, 24], sizes = [16, 8], strides = [1, 1]} : vector<16x32xf32> to vector<16x8xf32>
    %86 = vector.shape_cast %85 : vector<16x8xf32> to vector<2x8x8xf32>
    "tpu.trace_start"() <{level = 10 : i32, message = "bqd,bkd->bqk"}> : () -> ()
    %cst_27 = arith.constant dense<0.000000e+00> : vector<2x8x8xf32>
    %87 = tpu.matmul %82, %84, %cst_27 {dimension_numbers = #tpu.dot_dimension_numbers<[2], [2], [1], [1], [0, 0, 0, 1, 1, 1], [0], [0]>} : vector<2x8x8xf32>, vector<2x8x8xf32>, vector<2x8x8xf32> -> vector<2x8x8xf32>
    "tpu.trace_stop"() : () -> ()
    %cst_28 = arith.constant dense<0xFF800000> : vector<2x8xf32>
    %88 = vector.multi_reduction <maximumf>, %87, %cst_28 [2] : vector<2x8x8xf32> to vector<2x8xf32>
    %89 = vector.shape_cast %88 : vector<2x8xf32> to vector<2x8x1xf32>
    %90 = vector.broadcast %89 : vector<2x8x1xf32> to vector<2x8x8xf32>
    %91 = arith.subf %87, %90 : vector<2x8x8xf32>
    %92 = math.exp %91 : vector<2x8x8xf32>
    %cst_29 = arith.constant dense<0.000000e+00> : vector<2x8xf32>
    %93 = vector.multi_reduction <add>, %92, %cst_29 [2] : vector<2x8x8xf32> to vector<2x8xf32>
    %94 = vector.shape_cast %93 : vector<2x8xf32> to vector<2x8x1xf32>
    %95 = tpu.reciprocal %94 {approx = true} : vector<2x8x1xf32> -> vector<2x8x1xf32>
    %96 = vector.broadcast %95 : vector<2x8x1xf32> to vector<2x8x8xf32>
    %97 = arith.mulf %92, %96 : vector<2x8x8xf32>
    "tpu.trace_start"() <{level = 10 : i32, message = "bqk,bkd->bqd"}> : () -> ()
    %cst_30 = arith.constant dense<0.000000e+00> : vector<2x8x8xf32>
    %98 = tpu.matmul %97, %86, %cst_30 {dimension_numbers = #tpu.dot_dimension_numbers<[2], [1], [1], [2], [0, 0, 0, 1, 1, 2], [0], [0]>} : vector<2x8x8xf32>, vector<2x8x8xf32>, vector<2x8x8xf32> -> vector<2x8x8xf32>
    "tpu.trace_stop"() : () -> ()
    %99 = vector.shape_cast %98 : vector<2x8x8xf32> to vector<16x8xf32>
    %100 = vector.extract_strided_slice %12 {offsets = [24, 0], sizes = [8, 32], strides = [1, 1]} : vector<32x32xf32> to vector<8x32xf32>
    %cst_31 = arith.constant dense<0.000000e+00> : vector<16x32xf32>
    %101 = tpu.matmul %99, %100, %cst_31 {dimension_numbers = #tpu.dot_dimension_numbers<[1], [0], [0], [1], [0, 0, 1, 1], [], []>} : vector<16x8xf32>, vector<8x32xf32>, vector<16x32xf32> -> vector<16x32xf32>
    %102 = arith.addf %80, %101 : vector<16x32xf32>
    %103 = arith.addf %0, %102 : vector<16x32xf32>
    %c0_32 = arith.constant 0 : index
    %c0_33 = arith.constant 0 : index
    %104 = vector.load %arg6[%c0_32, %c0_33] : memref<1x32xf32, #tpu.memory_space<vmem>>, vector<1x32xf32>
    %c0_34 = arith.constant 0 : index
    %c0_35 = arith.constant 0 : index
    %105 = vector.load %arg7[%c0_34, %c0_35] : memref<1x32xf32, #tpu.memory_space<vmem>>, vector<1x32xf32>
    %cst_36 = arith.constant dense<0.000000e+00> : vector<16xf32>
    %106 = vector.multi_reduction <add>, %103, %cst_36 [1] : vector<16x32xf32> to vector<16xf32>
    %107 = vector.shape_cast %106 : vector<16xf32> to vector<16x1xf32>
    %cst_37 = arith.constant 3.200000e+01 : f32
    %108 = vector.broadcast %cst_37 : f32 to vector<16x1xf32>
    %109 = arith.divf %107, %108 : vector<16x1xf32>
    %110 = vector.broadcast %109 : vector<16x1xf32> to vector<16x32xf32>
    %111 = arith.subf %103, %110 : vector<16x32xf32>
    %112 = arith.mulf %111, %111 : vector<16x32xf32>
    %cst_38 = arith.constant dense<0.000000e+00> : vector<16xf32>
    %113 = vector.multi_reduction <add>, %112, %cst_38 [1] : vector<16x32xf32> to vector<16xf32>
    %114 = vector.shape_cast %113 : vector<16xf32> to vector<16x1xf32>
    %cst_39 = arith.constant 3.200000e+01 : f32
    %115 = vector.broadcast %cst_39 : f32 to vector<16x1xf32>
    %116 = arith.divf %114, %115 : vector<16x1xf32>
    %117 = vector.broadcast %109 : vector<16x1xf32> to vector<16x32xf32>
    %118 = arith.subf %103, %117 : vector<16x32xf32>
    %cst_40 = arith.constant 9.99999974E-6 : f32
    %119 = vector.broadcast %cst_40 : f32 to vector<16x1xf32>
    %120 = arith.addf %116, %119 : vector<16x1xf32>
    %121 = math.rsqrt %120 : vector<16x1xf32>
    %122 = vector.broadcast %121 : vector<16x1xf32> to vector<16x32xf32>
    %123 = arith.mulf %118, %122 : vector<16x32xf32>
    %124 = vector.broadcast %104 : vector<1x32xf32> to vector<16x32xf32>
    %125 = arith.mulf %123, %124 : vector<16x32xf32>
    %126 = vector.broadcast %105 : vector<1x32xf32> to vector<16x32xf32>
    %127 = arith.addf %125, %126 : vector<16x32xf32>
    %c0_41 = arith.constant 0 : index
    %c0_42 = arith.constant 0 : index
    %128 = vector.load %arg8[%c0_41, %c0_42] : memref<32x32xf32, #tpu.memory_space<vmem>>, vector<32x32xf32>
    %cst_43 = arith.constant dense<0.000000e+00> : vector<16x32xf32>
    %129 = tpu.matmul %127, %128, %cst_43 {dimension_numbers = #tpu.dot_dimension_numbers<[1], [0], [0], [1], [0, 0, 1, 1], [], []>} : vector<16x32xf32>, vector<32x32xf32>, vector<16x32xf32> -> vector<16x32xf32>
    %c0_44 = arith.constant 0 : index
    %c0_45 = arith.constant 0 : index
    %130 = vector.load %arg9[%c0_44, %c0_45] : memref<1x32xf32, #tpu.memory_space<vmem>>, vector<1x32xf32>
    %131 = vector.broadcast %130 : vector<1x32xf32> to vector<16x32xf32>
    %132 = arith.addf %129, %131 : vector<16x32xf32>
    %cst_46 = arith.constant 0.353553385 : f32
    %133 = vector.broadcast %cst_46 : f32 to vector<16x32xf32>
    %134 = arith.mulf %132, %133 : vector<16x32xf32>
    %c0_47 = arith.constant 0 : index
    %c0_48 = arith.constant 0 : index
    %135 = vector.load %arg10[%c0_47, %c0_48] : memref<32x64xf32, #tpu.memory_space<vmem>>, vector<32x64xf32>
    %cst_49 = arith.constant dense<0.000000e+00> : vector<16x64xf32>
    %136 = tpu.matmul %1, %135, %cst_49 {dimension_numbers = #tpu.dot_dimension_numbers<[1], [0], [0], [1], [0, 0, 1, 1], [], []>} : vector<16x32xf32>, vector<32x64xf32>, vector<16x64xf32> -> vector<16x64xf32>
    %c0_50 = arith.constant 0 : index
    %c0_51 = arith.constant 0 : index
    %137 = vector.load %arg11[%c0_50, %c0_51] : memref<1x64xf32, #tpu.memory_space<vmem>>, vector<1x64xf32>
    %138 = vector.broadcast %137 : vector<1x64xf32> to vector<16x64xf32>
    %139 = arith.addf %136, %138 : vector<16x64xf32>
    %140 = vector.extract_strided_slice %139 {offsets = [0, 0], sizes = [16, 32], strides = [1, 1]} : vector<16x64xf32> to vector<16x32xf32>
    %141 = vector.extract_strided_slice %139 {offsets = [0, 32], sizes = [16, 32], strides = [1, 1]} : vector<16x64xf32> to vector<16x32xf32>
    %c0_52 = arith.constant 0 : index
    %c0_53 = arith.constant 0 : index
    %142 = vector.load %arg12[%c0_52, %c0_53] : memref<32x32xf32, #tpu.memory_space<vmem>>, vector<32x32xf32>
    %c0_54 = arith.constant 0 : index
    %c0_55 = arith.constant 0 : index
    %143 = vector.load %arg13[%c0_54, %c0_55] : memref<1x32xf32, #tpu.memory_space<vmem>>, vector<1x32xf32>
    %cst_56 = arith.constant 0.000000e+00 : f32
    %144 = vector.broadcast %cst_56 : f32 to vector<2x8x8xf32>
    %145 = vector.extract_strided_slice %134 {offsets = [0, 0], sizes = [16, 8], strides = [1, 1]} : vector<16x32xf32> to vector<16x8xf32>
    %146 = vector.shape_cast %145 : vector<16x8xf32> to vector<2x8x8xf32>
    %147 = vector.extract_strided_slice %140 {offsets = [0, 0], sizes = [16, 8], strides = [1, 1]} : vector<16x32xf32> to vector<16x8xf32>
    %148 = vector.shape_cast %147 : vector<16x8xf32> to vector<2x8x8xf32>
    %149 = vector.extract_strided_slice %141 {offsets = [0, 0], sizes = [16, 8], strides = [1, 1]} : vector<16x32xf32> to vector<16x8xf32>
    %150 = vector.shape_cast %149 : vector<16x8xf32> to vector<2x8x8xf32>
    "tpu.trace_start"() <{level = 10 : i32, message = "bqd,bkd->bqk"}> : () -> ()
    %cst_57 = arith.constant dense<0.000000e+00> : vector<2x8x8xf32>
    %151 = tpu.matmul %146, %148, %cst_57 {dimension_numbers = #tpu.dot_dimension_numbers<[2], [2], [1], [1], [0, 0, 0, 1, 1, 1], [0], [0]>} : vector<2x8x8xf32>, vector<2x8x8xf32>, vector<2x8x8xf32> -> vector<2x8x8xf32>
    "tpu.trace_stop"() : () -> ()
    %cst_58 = arith.constant dense<0xFF800000> : vector<2x8xf32>
    %152 = vector.multi_reduction <maximumf>, %151, %cst_58 [2] : vector<2x8x8xf32> to vector<2x8xf32>
    %153 = vector.shape_cast %152 : vector<2x8xf32> to vector<2x8x1xf32>
    %154 = vector.broadcast %153 : vector<2x8x1xf32> to vector<2x8x8xf32>
    %155 = arith.subf %151, %154 : vector<2x8x8xf32>
    %156 = math.exp %155 : vector<2x8x8xf32>
    %cst_59 = arith.constant dense<0.000000e+00> : vector<2x8xf32>
    %157 = vector.multi_reduction <add>, %156, %cst_59 [2] : vector<2x8x8xf32> to vector<2x8xf32>
    %158 = vector.shape_cast %157 : vector<2x8xf32> to vector<2x8x1xf32>
    %159 = tpu.reciprocal %158 {approx = true} : vector<2x8x1xf32> -> vector<2x8x1xf32>
    %160 = vector.broadcast %159 : vector<2x8x1xf32> to vector<2x8x8xf32>
    %161 = arith.mulf %156, %160 : vector<2x8x8xf32>
    %162 = arith.addf %144, %161 : vector<2x8x8xf32>
    "tpu.trace_start"() <{level = 10 : i32, message = "bqk,bkd->bqd"}> : () -> ()
    %cst_60 = arith.constant dense<0.000000e+00> : vector<2x8x8xf32>
    %163 = tpu.matmul %161, %150, %cst_60 {dimension_numbers = #tpu.dot_dimension_numbers<[2], [1], [1], [2], [0, 0, 0, 1, 1, 2], [0], [0]>} : vector<2x8x8xf32>, vector<2x8x8xf32>, vector<2x8x8xf32> -> vector<2x8x8xf32>
    "tpu.trace_stop"() : () -> ()
    %164 = vector.shape_cast %163 : vector<2x8x8xf32> to vector<16x8xf32>
    %165 = vector.extract_strided_slice %142 {offsets = [0, 0], sizes = [8, 32], strides = [1, 1]} : vector<32x32xf32> to vector<8x32xf32>
    %cst_61 = arith.constant dense<0.000000e+00> : vector<16x32xf32>
    %166 = tpu.matmul %164, %165, %cst_61 {dimension_numbers = #tpu.dot_dimension_numbers<[1], [0], [0], [1], [0, 0, 1, 1], [], []>} : vector<16x8xf32>, vector<8x32xf32>, vector<16x32xf32> -> vector<16x32xf32>
    %167 = vector.broadcast %143 : vector<1x32xf32> to vector<16x32xf32>
    %168 = arith.addf %167, %166 : vector<16x32xf32>
    %169 = vector.extract_strided_slice %134 {offsets = [0, 8], sizes = [16, 8], strides = [1, 1]} : vector<16x32xf32> to vector<16x8xf32>
    %170 = vector.shape_cast %169 : vector<16x8xf32> to vector<2x8x8xf32>
    %171 = vector.extract_strided_slice %140 {offsets = [0, 8], sizes = [16, 8], strides = [1, 1]} : vector<16x32xf32> to vector<16x8xf32>
    %172 = vector.shape_cast %171 : vector<16x8xf32> to vector<2x8x8xf32>
    %173 = vector.extract_strided_slice %141 {offsets = [0, 8], sizes = [16, 8], strides = [1, 1]} : vector<16x32xf32> to vector<16x8xf32>
    %174 = vector.shape_cast %173 : vector<16x8xf32> to vector<2x8x8xf32>
    "tpu.trace_start"() <{level = 10 : i32, message = "bqd,bkd->bqk"}> : () -> ()
    %cst_62 = arith.constant dense<0.000000e+00> : vector<2x8x8xf32>
    %175 = tpu.matmul %170, %172, %cst_62 {dimension_numbers = #tpu.dot_dimension_numbers<[2], [2], [1], [1], [0, 0, 0, 1, 1, 1], [0], [0]>} : vector<2x8x8xf32>, vector<2x8x8xf32>, vector<2x8x8xf32> -> vector<2x8x8xf32>
    "tpu.trace_stop"() : () -> ()
    %cst_63 = arith.constant dense<0xFF800000> : vector<2x8xf32>
    %176 = vector.multi_reduction <maximumf>, %175, %cst_63 [2] : vector<2x8x8xf32> to vector<2x8xf32>
    %177 = vector.shape_cast %176 : vector<2x8xf32> to vector<2x8x1xf32>
    %178 = vector.broadcast %177 : vector<2x8x1xf32> to vector<2x8x8xf32>
    %179 = arith.subf %175, %178 : vector<2x8x8xf32>
    %180 = math.exp %179 : vector<2x8x8xf32>
    %cst_64 = arith.constant dense<0.000000e+00> : vector<2x8xf32>
    %181 = vector.multi_reduction <add>, %180, %cst_64 [2] : vector<2x8x8xf32> to vector<2x8xf32>
    %182 = vector.shape_cast %181 : vector<2x8xf32> to vector<2x8x1xf32>
    %183 = tpu.reciprocal %182 {approx = true} : vector<2x8x1xf32> -> vector<2x8x1xf32>
    %184 = vector.broadcast %183 : vector<2x8x1xf32> to vector<2x8x8xf32>
    %185 = arith.mulf %180, %184 : vector<2x8x8xf32>
    %186 = arith.addf %162, %185 : vector<2x8x8xf32>
    "tpu.trace_start"() <{level = 10 : i32, message = "bqk,bkd->bqd"}> : () -> ()
    %cst_65 = arith.constant dense<0.000000e+00> : vector<2x8x8xf32>
    %187 = tpu.matmul %185, %174, %cst_65 {dimension_numbers = #tpu.dot_dimension_numbers<[2], [1], [1], [2], [0, 0, 0, 1, 1, 2], [0], [0]>} : vector<2x8x8xf32>, vector<2x8x8xf32>, vector<2x8x8xf32> -> vector<2x8x8xf32>
    "tpu.trace_stop"() : () -> ()
    %188 = vector.shape_cast %187 : vector<2x8x8xf32> to vector<16x8xf32>
    %189 = vector.extract_strided_slice %142 {offsets = [8, 0], sizes = [8, 32], strides = [1, 1]} : vector<32x32xf32> to vector<8x32xf32>
    %cst_66 = arith.constant dense<0.000000e+00> : vector<16x32xf32>
    %190 = tpu.matmul %188, %189, %cst_66 {dimension_numbers = #tpu.dot_dimension_numbers<[1], [0], [0], [1], [0, 0, 1, 1], [], []>} : vector<16x8xf32>, vector<8x32xf32>, vector<16x32xf32> -> vector<16x32xf32>
    %191 = arith.addf %168, %190 : vector<16x32xf32>
    %192 = vector.extract_strided_slice %134 {offsets = [0, 16], sizes = [16, 8], strides = [1, 1]} : vector<16x32xf32> to vector<16x8xf32>
    %193 = vector.shape_cast %192 : vector<16x8xf32> to vector<2x8x8xf32>
    %194 = vector.extract_strided_slice %140 {offsets = [0, 16], sizes = [16, 8], strides = [1, 1]} : vector<16x32xf32> to vector<16x8xf32>
    %195 = vector.shape_cast %194 : vector<16x8xf32> to vector<2x8x8xf32>
    %196 = vector.extract_strided_slice %141 {offsets = [0, 16], sizes = [16, 8], strides = [1, 1]} : vector<16x32xf32> to vector<16x8xf32>
    %197 = vector.shape_cast %196 : vector<16x8xf32> to vector<2x8x8xf32>
    "tpu.trace_start"() <{level = 10 : i32, message = "bqd,bkd->bqk"}> : () -> ()
    %cst_67 = arith.constant dense<0.000000e+00> : vector<2x8x8xf32>
    %198 = tpu.matmul %193, %195, %cst_67 {dimension_numbers = #tpu.dot_dimension_numbers<[2], [2], [1], [1], [0, 0, 0, 1, 1, 1], [0], [0]>} : vector<2x8x8xf32>, vector<2x8x8xf32>, vector<2x8x8xf32> -> vector<2x8x8xf32>
    "tpu.trace_stop"() : () -> ()
    %cst_68 = arith.constant dense<0xFF800000> : vector<2x8xf32>
    %199 = vector.multi_reduction <maximumf>, %198, %cst_68 [2] : vector<2x8x8xf32> to vector<2x8xf32>
    %200 = vector.shape_cast %199 : vector<2x8xf32> to vector<2x8x1xf32>
    %201 = vector.broadcast %200 : vector<2x8x1xf32> to vector<2x8x8xf32>
    %202 = arith.subf %198, %201 : vector<2x8x8xf32>
    %203 = math.exp %202 : vector<2x8x8xf32>
    %cst_69 = arith.constant dense<0.000000e+00> : vector<2x8xf32>
    %204 = vector.multi_reduction <add>, %203, %cst_69 [2] : vector<2x8x8xf32> to vector<2x8xf32>
    %205 = vector.shape_cast %204 : vector<2x8xf32> to vector<2x8x1xf32>
    %206 = tpu.reciprocal %205 {approx = true} : vector<2x8x1xf32> -> vector<2x8x1xf32>
    %207 = vector.broadcast %206 : vector<2x8x1xf32> to vector<2x8x8xf32>
    %208 = arith.mulf %203, %207 : vector<2x8x8xf32>
    %209 = arith.addf %186, %208 : vector<2x8x8xf32>
    "tpu.trace_start"() <{level = 10 : i32, message = "bqk,bkd->bqd"}> : () -> ()
    %cst_70 = arith.constant dense<0.000000e+00> : vector<2x8x8xf32>
    %210 = tpu.matmul %208, %197, %cst_70 {dimension_numbers = #tpu.dot_dimension_numbers<[2], [1], [1], [2], [0, 0, 0, 1, 1, 2], [0], [0]>} : vector<2x8x8xf32>, vector<2x8x8xf32>, vector<2x8x8xf32> -> vector<2x8x8xf32>
    "tpu.trace_stop"() : () -> ()
    %211 = vector.shape_cast %210 : vector<2x8x8xf32> to vector<16x8xf32>
    %212 = vector.extract_strided_slice %142 {offsets = [16, 0], sizes = [8, 32], strides = [1, 1]} : vector<32x32xf32> to vector<8x32xf32>
    %cst_71 = arith.constant dense<0.000000e+00> : vector<16x32xf32>
    %213 = tpu.matmul %211, %212, %cst_71 {dimension_numbers = #tpu.dot_dimension_numbers<[1], [0], [0], [1], [0, 0, 1, 1], [], []>} : vector<16x8xf32>, vector<8x32xf32>, vector<16x32xf32> -> vector<16x32xf32>
    %214 = arith.addf %191, %213 : vector<16x32xf32>
    %215 = vector.extract_strided_slice %134 {offsets = [0, 24], sizes = [16, 8], strides = [1, 1]} : vector<16x32xf32> to vector<16x8xf32>
    %216 = vector.shape_cast %215 : vector<16x8xf32> to vector<2x8x8xf32>
    %217 = vector.extract_strided_slice %140 {offsets = [0, 24], sizes = [16, 8], strides = [1, 1]} : vector<16x32xf32> to vector<16x8xf32>
    %218 = vector.shape_cast %217 : vector<16x8xf32> to vector<2x8x8xf32>
    %219 = vector.extract_strided_slice %141 {offsets = [0, 24], sizes = [16, 8], strides = [1, 1]} : vector<16x32xf32> to vector<16x8xf32>
    %220 = vector.shape_cast %219 : vector<16x8xf32> to vector<2x8x8xf32>
    "tpu.trace_start"() <{level = 10 : i32, message = "bqd,bkd->bqk"}> : () -> ()
    %cst_72 = arith.constant dense<0.000000e+00> : vector<2x8x8xf32>
    %221 = tpu.matmul %216, %218, %cst_72 {dimension_numbers = #tpu.dot_dimension_numbers<[2], [2], [1], [1], [0, 0, 0, 1, 1, 1], [0], [0]>} : vector<2x8x8xf32>, vector<2x8x8xf32>, vector<2x8x8xf32> -> vector<2x8x8xf32>
    "tpu.trace_stop"() : () -> ()
    %cst_73 = arith.constant dense<0xFF800000> : vector<2x8xf32>
    %222 = vector.multi_reduction <maximumf>, %221, %cst_73 [2] : vector<2x8x8xf32> to vector<2x8xf32>
    %223 = vector.shape_cast %222 : vector<2x8xf32> to vector<2x8x1xf32>
    %224 = vector.broadcast %223 : vector<2x8x1xf32> to vector<2x8x8xf32>
    %225 = arith.subf %221, %224 : vector<2x8x8xf32>
    %226 = math.exp %225 : vector<2x8x8xf32>
    %cst_74 = arith.constant dense<0.000000e+00> : vector<2x8xf32>
    %227 = vector.multi_reduction <add>, %226, %cst_74 [2] : vector<2x8x8xf32> to vector<2x8xf32>
    %228 = vector.shape_cast %227 : vector<2x8xf32> to vector<2x8x1xf32>
    %229 = tpu.reciprocal %228 {approx = true} : vector<2x8x1xf32> -> vector<2x8x1xf32>
    %230 = vector.broadcast %229 : vector<2x8x1xf32> to vector<2x8x8xf32>
    %231 = arith.mulf %226, %230 : vector<2x8x8xf32>
    %232 = arith.addf %209, %231 : vector<2x8x8xf32>
    "tpu.trace_start"() <{level = 10 : i32, message = "bqk,bkd->bqd"}> : () -> ()
    %cst_75 = arith.constant dense<0.000000e+00> : vector<2x8x8xf32>
    %233 = tpu.matmul %231, %220, %cst_75 {dimension_numbers = #tpu.dot_dimension_numbers<[2], [1], [1], [2], [0, 0, 0, 1, 1, 2], [0], [0]>} : vector<2x8x8xf32>, vector<2x8x8xf32>, vector<2x8x8xf32> -> vector<2x8x8xf32>
    "tpu.trace_stop"() : () -> ()
    %234 = vector.shape_cast %233 : vector<2x8x8xf32> to vector<16x8xf32>
    %235 = vector.extract_strided_slice %142 {offsets = [24, 0], sizes = [8, 32], strides = [1, 1]} : vector<32x32xf32> to vector<8x32xf32>
    %cst_76 = arith.constant dense<0.000000e+00> : vector<16x32xf32>
    %236 = tpu.matmul %234, %235, %cst_76 {dimension_numbers = #tpu.dot_dimension_numbers<[1], [0], [0], [1], [0, 0, 1, 1], [], []>} : vector<16x8xf32>, vector<8x32xf32>, vector<16x32xf32> -> vector<16x32xf32>
    %237 = arith.addf %214, %236 : vector<16x32xf32>
    %238 = arith.addf %127, %237 : vector<16x32xf32>
    %c0_77 = arith.constant 0 : index
    %c0_78 = arith.constant 0 : index
    %239 = vector.load %arg14[%c0_77, %c0_78] : memref<1x32xf32, #tpu.memory_space<vmem>>, vector<1x32xf32>
    %c0_79 = arith.constant 0 : index
    %c0_80 = arith.constant 0 : index
    %240 = vector.load %arg15[%c0_79, %c0_80] : memref<1x32xf32, #tpu.memory_space<vmem>>, vector<1x32xf32>
    %cst_81 = arith.constant dense<0.000000e+00> : vector<16xf32>
    %241 = vector.multi_reduction <add>, %238, %cst_81 [1] : vector<16x32xf32> to vector<16xf32>
    %242 = vector.shape_cast %241 : vector<16xf32> to vector<16x1xf32>
    %cst_82 = arith.constant 3.200000e+01 : f32
    %243 = vector.broadcast %cst_82 : f32 to vector<16x1xf32>
    %244 = arith.divf %242, %243 : vector<16x1xf32>
    %245 = vector.broadcast %244 : vector<16x1xf32> to vector<16x32xf32>
    %246 = arith.subf %238, %245 : vector<16x32xf32>
    %247 = arith.mulf %246, %246 : vector<16x32xf32>
    %cst_83 = arith.constant dense<0.000000e+00> : vector<16xf32>
    %248 = vector.multi_reduction <add>, %247, %cst_83 [1] : vector<16x32xf32> to vector<16xf32>
    %249 = vector.shape_cast %248 : vector<16xf32> to vector<16x1xf32>
    %cst_84 = arith.constant 3.200000e+01 : f32
    %250 = vector.broadcast %cst_84 : f32 to vector<16x1xf32>
    %251 = arith.divf %249, %250 : vector<16x1xf32>
    %252 = vector.broadcast %244 : vector<16x1xf32> to vector<16x32xf32>
    %253 = arith.subf %238, %252 : vector<16x32xf32>
    %cst_85 = arith.constant 9.99999974E-6 : f32
    %254 = vector.broadcast %cst_85 : f32 to vector<16x1xf32>
    %255 = arith.addf %251, %254 : vector<16x1xf32>
    %256 = math.rsqrt %255 : vector<16x1xf32>
    %257 = vector.broadcast %256 : vector<16x1xf32> to vector<16x32xf32>
    %258 = arith.mulf %253, %257 : vector<16x32xf32>
    %259 = vector.broadcast %239 : vector<1x32xf32> to vector<16x32xf32>
    %260 = arith.mulf %258, %259 : vector<16x32xf32>
    %261 = vector.broadcast %240 : vector<1x32xf32> to vector<16x32xf32>
    %262 = arith.addf %260, %261 : vector<16x32xf32>
    %cst_86 = arith.constant 2.500000e-01 : f32
    %263 = vector.broadcast %cst_86 : f32 to vector<2x8x8xf32>
    %264 = arith.mulf %232, %263 : vector<2x8x8xf32>
    %c0_87 = arith.constant 0 : index
    %c0_88 = arith.constant 0 : index
    %c0_89 = arith.constant 0 : index
    %265 = vector.load %arg23[%c0_87, %c0_88, %c0_89] : memref<2x8x8xf32, #tpu.memory_space<vmem>>, vector<2x8x8xf32>
    tpu.vector_store %arg23[%c0_87, %c0_88, %c0_89], %264 {strides = array<i32>} : memref<2x8x8xf32, #tpu.memory_space<vmem>>, vector<2x8x8xf32>,
    %c0_90 = arith.constant 0 : index
    %c0_91 = arith.constant 0 : index
    %266 = vector.load %arg16[%c0_90, %c0_91] : memref<32x64xf32, #tpu.memory_space<vmem>>, vector<32x64xf32>
    %cst_92 = arith.constant dense<0.000000e+00> : vector<16x64xf32>
    %267 = tpu.matmul %262, %266, %cst_92 {dimension_numbers = #tpu.dot_dimension_numbers<[1], [0], [0], [1], [0, 0, 1, 1], [], []>} : vector<16x32xf32>, vector<32x64xf32>, vector<16x64xf32> -> vector<16x64xf32>
    %c0_93 = arith.constant 0 : index
    %c0_94 = arith.constant 0 : index
    %268 = vector.load %arg17[%c0_93, %c0_94] : memref<1x64xf32, #tpu.memory_space<vmem>>, vector<1x64xf32>
    %269 = vector.broadcast %268 : vector<1x64xf32> to vector<16x64xf32>
    %270 = arith.addf %267, %269 : vector<16x64xf32>
    %cst_95 = arith.constant 0.000000e+00 : f32
    %271 = vector.broadcast %cst_95 : f32 to vector<16x64xf32>
    %272 = arith.maximumf %270, %271 : vector<16x64xf32>
    %c0_96 = arith.constant 0 : index
    %c0_97 = arith.constant 0 : index
    %273 = vector.load %arg18[%c0_96, %c0_97] : memref<64x32xf32, #tpu.memory_space<vmem>>, vector<64x32xf32>
    %cst_98 = arith.constant dense<0.000000e+00> : vector<16x32xf32>
    %274 = tpu.matmul %272, %273, %cst_98 {dimension_numbers = #tpu.dot_dimension_numbers<[1], [0], [0], [1], [0, 0, 1, 1], [], []>} : vector<16x64xf32>, vector<64x32xf32>, vector<16x32xf32> -> vector<16x32xf32>
    %c0_99 = arith.constant 0 : index
    %c0_100 = arith.constant 0 : index
    %275 = vector.load %arg19[%c0_99, %c0_100] : memref<1x32xf32, #tpu.memory_space<vmem>>, vector<1x32xf32>
    %276 = vector.broadcast %275 : vector<1x32xf32> to vector<16x32xf32>
    %277 = arith.addf %274, %276 : vector<16x32xf32>
    %278 = arith.addf %262, %277 : vector<16x32xf32>
    %c0_101 = arith.constant 0 : index
    %c0_102 = arith.constant 0 : index
    %279 = vector.load %arg20[%c0_101, %c0_102] : memref<1x32xf32, #tpu.memory_space<vmem>>, vector<1x32xf32>
    %c0_103 = arith.constant 0 : index
    %c0_104 = arith.constant 0 : index
    %280 = vector.load %arg21[%c0_103, %c0_104] : memref<1x32xf32, #tpu.memory_space<vmem>>, vector<1x32xf32>
    %cst_105 = arith.constant dense<0.000000e+00> : vector<16xf32>
    %281 = vector.multi_reduction <add>, %278, %cst_105 [1] : vector<16x32xf32> to vector<16xf32>
    %282 = vector.shape_cast %281 : vector<16xf32> to vector<16x1xf32>
    %cst_106 = arith.constant 3.200000e+01 : f32
    %283 = vector.broadcast %cst_106 : f32 to vector<16x1xf32>
    %284 = arith.divf %282, %283 : vector<16x1xf32>
    %285 = vector.broadcast %284 : vector<16x1xf32> to vector<16x32xf32>
    %286 = arith.subf %278, %285 : vector<16x32xf32>
    %287 = arith.mulf %286, %286 : vector<16x32xf32>
    %cst_107 = arith.constant dense<0.000000e+00> : vector<16xf32>
    %288 = vector.multi_reduction <add>, %287, %cst_107 [1] : vector<16x32xf32> to vector<16xf32>
    %289 = vector.shape_cast %288 : vector<16xf32> to vector<16x1xf32>
    %cst_108 = arith.constant 3.200000e+01 : f32
    %290 = vector.broadcast %cst_108 : f32 to vector<16x1xf32>
    %291 = arith.divf %289, %290 : vector<16x1xf32>
    %292 = vector.broadcast %284 : vector<16x1xf32> to vector<16x32xf32>
    %293 = arith.subf %278, %292 : vector<16x32xf32>
    %cst_109 = arith.constant 9.99999974E-6 : f32
    %294 = vector.broadcast %cst_109 : f32 to vector<16x1xf32>
    %295 = arith.addf %291, %294 : vector<16x1xf32>
    %296 = math.rsqrt %295 : vector<16x1xf32>
    %297 = vector.broadcast %296 : vector<16x1xf32> to vector<16x32xf32>
    %298 = arith.mulf %293, %297 : vector<16x32xf32>
    %299 = vector.broadcast %279 : vector<1x32xf32> to vector<16x32xf32>
    %300 = arith.mulf %298, %299 : vector<16x32xf32>
    %301 = vector.broadcast %280 : vector<1x32xf32> to vector<16x32xf32>
    %302 = arith.addf %300, %301 : vector<16x32xf32>
    %c0_110 = arith.constant 0 : index
    %c0_111 = arith.constant 0 : index
    %303 = vector.load %arg22[%c0_110, %c0_111] : memref<16x32xf32, #tpu.memory_space<vmem>>, vector<16x32xf32>
    tpu.vector_store %arg22[%c0_110, %c0_111], %302 {strides = array<i32>} : memref<16x32xf32, #tpu.memory_space<vmem>>, vector<16x32xf32>,
    return
  }
}

</mosaic_0001>

<bundles_post_ra>
// kernel: transformer_decoder_layer.1
= control target key start
LH: loop header
LB: loop body
LE: loop exit
PB: predicated region body
PF: predicated region fallthrough
CT: control target
= control target key end

     0   :  { %s5347_s0 = inlined_call_operand.vmem [shape: f32[16,32], index: 0, kind: input, shape index: {}]   ;;  %s5348_s1 = inlined_call_operand.vmem [shape: f32[16,32], index: 1, kind: input, shape index: {}]   ;;  %s5349_s2 = inlined_call_operand.vmem [shape: f32[32,96], index: 2, kind: input, shape index: {}]   ;;  %s5350_s3 = inlined_call_operand.vmem [shape: f32[1,96], index: 3, kind: input, shape index: {}]   ;;  %s5351_s4 = inlined_call_operand.vmem [shape: f32[32,32], index: 4, kind: input, shape index: {}]   ;;  %s5352_s5 = inlined_call_operand.vmem [shape: f32[1,32], index: 5, kind: input, shape index: {}]   ;;  %s5353_s6 = inlined_call_operand.vmem [shape: f32[1,32], index: 6, kind: input, shape index: {}]   ;;  %s5354_s7 = inlined_call_operand.vmem [shape: f32[1,32], index: 7, kind: input, shape index: {}]   ;;  %s5355_s8 = inlined_call_operand.vmem [shape: f32[32,32], index: 8, kind: input, shape index: {}]   ;;  %s5356_s9 = inlined_call_operand.vmem [shape: f32[1,32], index: 9, kind: input, shape index: {}]   ;;  %s5357_s10 = inlined_call_operand.vmem [shape: f32[32,64], index: 10, kind: input, shape index: {}]   ;;  %s5358_s11 = inlined_call_operand.vmem [shape: f32[1,64], index: 11, kind: input, shape index: {}]   ;;  %s5359_s12 = inlined_call_operand.vmem [shape: f32[32,32], index: 12, kind: input, shape index: {}]   ;;  %s5360_s13 = inlined_call_operand.vmem [shape: f32[1,32], index: 13, kind: input, shape index: {}]   ;;  %s5361_s14 = inlined_call_operand.vmem [shape: f32[1,32], index: 14, kind: input, shape index: {}]   ;;  %s5362_s15 = inlined_call_operand.vmem [shape: f32[1,32], index: 15, kind: input, shape index: {}]   ;;  %s5363_s16 = inlined_call_operand.vmem [shape: f32[32,64], index: 16, kind: input, shape index: {}]   ;;  %s5364_s17 = inlined_call_operand.vmem [shape: f32[1,64], index: 17, kind: input, shape index: {}]   ;;  %s5365_s18 = inlined_call_operand.vmem [shape: f32[64,32], index: 18, kind: input, shape index: {}]   ;;  %s5366_s19 = inlined_call_operand.vmem [shape: f32[1,32], index: 19, kind: input, shape index: {}]   ;;  %s5367_s20 = inlined_call_operand.vmem [shape: f32[1,32], index: 20, kind: input, shape index: {}]   ;;  %s5368_s21 = inlined_call_operand.vmem [shape: f32[1,32], index: 21, kind: input, shape index: {}]   ;;  %s5369_s22 = inlined_call_operand.vmem [shape: f32[16,32], index: 22, kind: output, shape index: {0}]   ;;  %s5370_s23 = inlined_call_operand.hbm [shape: f32[2,8,8], index: 23, kind: output, shape index: {1}]  }
   0x1   :  { %5381 = sst [smem:[#allocation5_spill]] %s5347_s0 }
   0x2   :  { %5382 = sst [smem:[#allocation6_spill]] %s5348_s1 }
   0x3   :  { %5383 = sst [smem:[#allocation7_spill]] %s5349_s2 }
   0x4   :  { %5384 = sst [smem:[#allocation8_spill]] %s5350_s3 }
   0x5   :  { %5385 = sst [smem:[#allocation9_spill]] %s5351_s4 }
   0x6   :  { %5386 = sst [smem:[#allocation10_spill]] %s5352_s5 }
   0x7   :  { %5387 = sst [smem:[#allocation11_spill]] %s5353_s6 }
   0x8   :  { %5388 = sst [smem:[#allocation12_spill]] %s5354_s7 }
   0x9   :  { %s5389_s24 = sld [smem:[#allocation7_spill]]  ;;  %vm89_vm0 = vcmask 261120   ;;  %s5390_s28 = sld [smem:[#allocation5_spill]] }
   0xf   :  { %v78_v0 = vld [vmem:[%s5389_s24] sm:$0xff]  ;;  %v79_v1 = vld [vmem:[%s5389_s24 + $0x8] sm:$0xff]  ;;  %v80_v2 = vld [vmem:[%s5389_s24 + $0x10] sm:$0xff] }
  0x10   :  { %v4518_v3 = vpack.c.bf16 %v79_v1, %v78_v0  ;;  %v81_v4 = vld [vmem:[%s5389_s24 + $0x18] sm:$0xff]  ;;  %v4849_v5 = vld [vmem:[%s5390_s28] sm:$0xff] }
  0x11   :  { %v4522_v6 = vpack.c.bf16 %v81_v4, %v80_v2  ;;  %4263 = vmatprep.mubr.msk.f32.mxu1 %vm89_vm0, %v4849_v5 }
  0x12   :  { %29 = vsyncpa [#allocation3], 0  ;;  %4519 = vmatprep.subr.bf16.mxu1 %v4518_v3  ;;  %v4856_v7 = vld [vmem:[%s5390_s28 + $0x8] sm:$0xff]  ;;  %v4698_v8 = vmov 0.0   ;;  %vm4699_vm1 = vmmov 0   ;;  %s5391_s30 = sld [smem:[#allocation8_spill]] }
  0x13   :  { %4521 = vmatpush3.bf16.msra.mxu1 %v4518_v3  ;;  %4276 = vmatprep.subr.mxu0 %v4698_v8  ;;  %s4700_s24 = smov 96   ;;  %vm181_vm2 = vcmask 64512   ;;  %s4701_s25 = smov 64   ;;  %vm3896_vm3 = vcmask 523264  }
  0x14   :  { %4523 = vmatprep.subr.bf16.mxu1 %v4522_v6  ;;  %4278 = vmatprep.mubr.msk.f32.mxu0 %vm4699_vm1, %v4698_v8  ;;  %s4702_s5 = smov 88   ;;  %s4703_s1 = smov 120  }
  0x15   :  { %s5392_s6 = sld [smem:[#allocation9_spill]]  ;;  %s4704_s27 = smov 56  }
  0x16   :  { %s4705_s7 = smov 112   ;;  %s5379_s28 = smov 80  }
  0x17   :  { %4525 = vmatpush3.bf16.msra.mxu1 %v4522_v6  ;;  %s4707_s29 = smov 48   ;;  %s5375_s3 = smov 72  }
  0x18   :  { %4266 = vmatprep.subr.mxu1 %v4698_v8  ;;  %v4046_v9 = vld [vmem:[%s5391_s30] ss:$0 sm:$0xff]  ;;  %s5377_s0 = smov 104   ;;  %s4710_s2 = smov 40  }
  0x1a   :  { %4264 = vmatmul.mubr.msk.f32.vlgmr.msra.gmra.mrb[0].mxu1 %vm89_vm0, %v4856_v7 }
  0x1b   :  { %4268 = vmatprep.mubr.msk.f32.mxu1 %vm4699_vm1, %v4698_v8  ;;  %v173_v35 = vld [vmem:[%s5392_s6] sm:$0xff] }
  0xed   :  { %v4265_v10 = vpop.f32.mrb[0].mxu1 }
  0xee   :  { %v162_v11 = vpop.f32.mrb[1].mxu1  ;;  %v4873_v13 = vadd.f32 %v4265_v10, %v4046_v9 }
  0xef   :  { %v4869_v12 = vadd.f32 %v4046_v9, %v162_v11 }
  0xf0   :  { %v4888_v17 = vmul.f32 0.35355338, %v4873_v13 }
  0xf1   :  { %179 = vrot.lane.b32.xlu0 %v4869_v12, %s4700_s24  ;;  %v4880_v15 = vmul.f32 0.35355338, %v4869_v12 }
  0xf5   :  { %258 = vrot.lane.b32.xlu0 %v4873_v13, %s4700_s24 }
 0x163   :  { %v180_v14 = vpop.permute.xlu0 %179 }
 0x164   :  { %4267 = vmatpush3.xpose.msk.msra.mxu1 %vm181_vm2, %v180_v14 }
 0x165   :  { %4271 = vmatprep.subr.mxu1 %v4698_v8 }
 0x167   :  { %v259_v16 = vpop.permute.xlu0 %258  ;;  %4269 = vmatmul.mubr.msk.f32.vlgmr.msra.gmra.mrb[2].mxu1 %vm181_vm2, %v4880_v15 }
 0x168   :  { %4272 = vmatpush3.xpose.msk.msra.mxu1 %vm181_vm2, %v259_v16  ;;  %4273 = vmatprep.mubr.msk.f32.mxu1 %vm4699_vm1, %v4698_v8 }
 0x169   :  { %4281 = vmatprep.subr.mxu1 %v4698_v8 }
 0x16b   :  { %4274 = vmatmul.mubr.msk.f32.vlgmr.msra.gmra.mrb[4].mxu1 %vm181_vm2, %v4888_v17 }
 0x16c   :  { %4283 = vmatprep.mubr.msk.f32.mxu1 %vm4699_vm1, %v4698_v8 }
 0x23a   :  { %v253_v18 = vpop.f32.mrb[2].mxu1 }
 0x23b   :  { %v4270_v19 = vpop.f32.mrb[3].mxu1  ;;  %v335_v20 = vsel %vm181_vm2, %v253_v18, -inf }
 0x23c   :  { %336 = vmax.xlane.f32.xlu1 %v335_v20 }
 0x23e   :  { %v331_v21 = vpop.f32.mrb[4].mxu1 }
 0x23f   :  { %v4275_v22 = vpop.f32.mrb[5].mxu1  ;;  %v338_v23 = vsel %vm181_vm2, %v331_v21, -inf }
 0x240   :  { %339 = vmax.xlane.f32.xlu1 %v338_v23 }
 0x251   :  { %357 = vrot.lane.b32.xlu1 %v4869_v12, %s4701_s25 }
 0x2c9   :  { %v337_v24 = vpop.xlane.xlu1 %336 }
 0x2ca   :  { %v341_v25 = vsub.f32 %v253_v18, %v337_v24 }
 0x2cc   :  { %v343_v26 = vmul.f32 1.442695, %v341_v25 }
 0x2cd   :  { %v340_v27 = vpop.xlane.xlu1 %339 }
 0x2ce   :  { %4598 = vpow2.f32 %v343_v26  ;;  %v342_v28 = vsub.f32 %v331_v21, %v340_v27 }
 0x2d0   :  { %v345_v29 = vmul.f32 1.442695, %v342_v28 }
 0x2d1   :  { %v358_v30 = vpop.permute.xlu1 %357 }
 0x2d2   :  { %4600 = vpow2.f32 %v345_v29  ;;  %4277 = vmatpush3.msra.mxu0 %v358_v30  ;;  %v174_v30 = vld [vmem:[%s5392_s6 + $0x8] sm:$0xff] }
 0x2d3   :  { %4286 = vmatprep.subr.mxu0 %v173_v35 }
 0x2d8   :  { %v4599_v31 = vpop.eup %4598 }
 0x2d9   :  { %v347_v32 = vsel %vm181_vm2, %v4599_v31, 0.0 }
 0x2da   :  { %348 = vadd.xlane.f32.xlu0 %v347_v32 }
 0x2dc   :  { %v4601_v33 = vpop.eup %4600 }
 0x2dd   :  { %v350_v34 = vsel %vm181_vm2, %v4601_v33, 0.0 }
 0x2de   :  { %351 = vadd.xlane.f32.xlu1 %v350_v34 }
 0x2ef   :  { %433 = vrot.lane.b32.xlu1 %v4873_v13, %s4701_s25  ;;  %s5393_s25 = sld [smem:[#allocation10_spill]] }
 0x2f0   :  { %678 = vrot.lane.b32.xlu0 %v4873_v13, %s4702_s5 }
 0x2f3   :  { %600 = vrot.lane.b32.xlu1 %v4869_v12, %s4702_s5 }
 0x2f7   :  { %598 = vrot.lane.b32.xlu1 %v4880_v15, %s4703_s1 }
 0x2fb   :  { %676 = vrot.lane.b32.xlu1 %v4888_v17, %s4703_s1 }
 0x367   :  { %v349_v36 = vpop.xlane.xlu0 %348 }
 0x368   :  { %4602 = vrcp.f32 %v349_v36 }
 0x36b   :  { %v352_v37 = vpop.xlane.xlu1 %351  ;;  %v679_v48 = vpop.permute.xlu0 %678 }
 0x36c   :  { %4604 = vrcp.f32 %v352_v37 }
 0x36f   :  { %v434_v38 = vpop.permute.xlu1 %433 }
 0x370   :  { %4282 = vmatpush3.msra.mxu1 %v434_v38 }
 0x371   :  { %4291 = vmatprep.subr.mxu1 %v4698_v8 }
 0x372   :  { %v4603_v39 = vpop.eup %4602 }
 0x373   :  { %v355_v40 = vmul.f32 %v4603_v39, %v4599_v31  ;;  %v601_v42 = vpop.permute.xlu1 %600 }
 0x375   :  { %4279 = vmatmul.mubr.msk.f32.vlgmr.msra.gmra.mrb[0].mxu0 %vm181_vm2, %v355_v40 }
 0x376   :  { %v4605_v41 = vpop.eup %4604  ;;  %4287 = vmatpush3.msra.mxu0 %v173_v35 }
 0x377   :  { %v356_v43 = vmul.f32 %v4605_v41, %v4601_v33  ;;  %4296 = vmatprep.subr.mxu0 %v4698_v8  ;;  %v599_v44 = vpop.permute.xlu1 %598 }
 0x379   :  { %4284 = vmatmul.mubr.msk.f32.vlgmr.msra.gmra.mrb[6].mxu1 %vm181_vm2, %v356_v43 }
 0x37a   :  { %4292 = vmatpush3.xpose.msk.msra.mxu1 %vm181_vm2, %v601_v42  ;;  %4293 = vmatprep.mubr.msk.f32.mxu1 %vm4699_vm1, %v4698_v8 }
 0x37b   :  { %4301 = vmatprep.subr.mxu1 %v4698_v8  ;;  %v677_v50 = vpop.permute.xlu1 %676 }
 0x37d   :  { %4294 = vmatmul.mubr.msk.f32.vlgmr.msra.gmra.mrb[8].mxu1 %vm181_vm2, %v599_v44 }
 0x37e   :  { %4303 = vmatprep.mubr.msk.f32.mxu1 %vm4699_vm1, %v4698_v8 }
 0x448   :  { %v429_v45 = vpop.f32.mrb[0].mxu0 }
 0x449   :  { %v4280_v46 = vpop.f32.mrb[1].mxu0  ;;  %4288 = vmatprep.mubr.msk.f32.mxu0 %vm181_vm2, %v429_v45  ;;  %v175_v45 = vld [vmem:[%s5392_s6 + $0x10] sm:$0xff] }
 0x44c   :  { %v505_v47 = vpop.f32.mrb[6].mxu1 }
 0x44d   :  { %v4285_v49 = vpop.f32.mrb[7].mxu1  ;;  %4289 = vmatmul.mubr.msk.f32.vlgmr.msra.gmra.mrb[2].mxu0 %vm181_vm2, %v505_v47 }
 0x44e   :  { %4297 = vmatpush3.xpose.msk.msra.mxu0 %vm181_vm2, %v679_v48  ;;  %4298 = vmatprep.mubr.msk.f32.mxu0 %vm4699_vm1, %v4698_v8 }
 0x44f   :  { %4306 = vmatprep.subr.mxu0 %v4698_v8 }
 0x450   :  { %v672_v51 = vpop.f32.mrb[8].mxu1 }
 0x451   :  { %v4295_v52 = vpop.f32.mrb[9].mxu1  ;;  %4299 = vmatmul.mubr.msk.f32.vlgmr.msra.gmra.mrb[4].mxu0 %vm181_vm2, %v677_v50  ;;  %v754_v53 = vsel %vm181_vm2, %v672_v51, -inf }
 0x452   :  { %755 = vmax.xlane.f32.xlu1 %v754_v53  ;;  %4308 = vmatprep.mubr.msk.f32.mxu0 %vm4699_vm1, %v4698_v8 }
 0x463   :  { %776 = vrot.lane.b32.xlu1 %v4869_v12, %s4704_s27 }
 0x467   :  { %1011 = vrot.lane.b32.xlu1 %v4880_v15, %s4705_s7 }
 0x46b   :  { %1091 = vrot.lane.b32.xlu1 %v4873_v13, %s5379_s28 }
 0x46f   :  { %1089 = vrot.lane.b32.xlu1 %v4888_v17, %s4705_s7 }
 0x4df   :  { %v756_v54 = vpop.xlane.xlu1 %755 }
 0x4e0   :  { %v760_v55 = vsub.f32 %v672_v51, %v756_v54 }
 0x4e2   :  { %v762_v56 = vmul.f32 1.442695, %v760_v55 }
 0x4e3   :  { %v777_v57 = vpop.permute.xlu1 %776 }
 0x4e4   :  { %4606 = vpow2.f32 %v762_v56  ;;  %4302 = vmatpush3.msra.mxu1 %v777_v57 }
 0x4e5   :  { %4316 = vmatprep.subr.mxu1 %v4698_v8 }
 0x4e7   :  { %v1012_v0 = vpop.permute.xlu1 %1011 }
 0x4eb   :  { %v1092_v4 = vpop.permute.xlu1 %1091 }
 0x4ee   :  { %v4607_v58 = vpop.eup %4606 }
 0x4ef   :  { %v766_v59 = vsel %vm181_vm2, %v4607_v58, 0.0  ;;  %v1090_v6 = vpop.permute.xlu1 %1089 }
 0x4f0   :  { %767 = vadd.xlane.f32.xlu0 %v766_v59 }
 0x506   :  { %1013 = vrot.lane.b32.xlu0 %v4869_v12, %s5379_s28  ;;  %s5394_s28 = sld [smem:[#allocation6_spill]] }
 0x524   :  { %v750_v60 = vpop.f32.mrb[4].mxu0 }
 0x525   :  { %v4300_v61 = vpop.f32.mrb[5].mxu0  ;;  %v757_v62 = vsel %vm181_vm2, %v750_v60, -inf }
 0x526   :  { %758 = vmax.xlane.f32.xlu1 %v757_v62 }
 0x57d   :  { %v768_v63 = vpop.xlane.xlu0 %767 }
 0x57e   :  { %4608 = vrcp.f32 %v768_v63 }
 0x581   :  { %v1014_v3 = vpop.permute.xlu0 %1013 }
 0x588   :  { %v4609_v1 = vpop.eup %4608 }
 0x589   :  { %v774_v2 = vmul.f32 %v4609_v1, %v4607_v58 }
 0x58b   :  { %4304 = vmatmul.mubr.msk.f32.vlgmr.msra.gmra.mrb[10].mxu1 %vm181_vm2, %v774_v2 }
 0x58c   :  { %4317 = vmatpush3.xpose.msk.msra.mxu1 %vm181_vm2, %v1014_v3  ;;  %4318 = vmatprep.mubr.msk.f32.mxu1 %vm4699_vm1, %v4698_v8 }
 0x58d   :  { %4321 = vmatprep.subr.mxu1 %v4698_v8 }
 0x58f   :  { %4319 = vmatmul.mubr.msk.f32.vlgmr.msra.gmra.mrb[12].mxu1 %vm181_vm2, %v1012_v0 }
 0x590   :  { %4322 = vmatpush3.xpose.msk.msra.mxu1 %vm181_vm2, %v1092_v4  ;;  %4323 = vmatprep.mubr.msk.f32.mxu1 %vm4699_vm1, %v4698_v8 }
 0x591   :  { %4331 = vmatprep.subr.mxu1 %v4698_v8 }
 0x593   :  { %4324 = vmatmul.mubr.msk.f32.vlgmr.msra.gmra.mrb[14].mxu1 %vm181_vm2, %v1090_v6 }
 0x594   :  { %4333 = vmatprep.mubr.msk.f32.mxu1 %vm4699_vm1, %v4698_v8 }
 0x5b3   :  { %v759_v9 = vpop.xlane.xlu1 %758 }
 0x5b4   :  { %v761_v10 = vsub.f32 %v750_v60, %v759_v9 }
 0x5b6   :  { %v764_v11 = vmul.f32 1.442695, %v761_v10 }
 0x5b8   :  { %4610 = vpow2.f32 %v764_v11 }
 0x5c2   :  { %v4611_v14 = vpop.eup %4610 }
 0x5c3   :  { %v769_v16 = vsel %vm181_vm2, %v4611_v14, 0.0 }
 0x5c4   :  { %770 = vadd.xlane.f32.xlu0 %v769_v16 }
 0x5da   :  { %852 = vrot.lane.b32.xlu0 %v4873_v13, %s4704_s27 }
 0x5de   :  { %1265 = vrot.lane.b32.xlu0 %v4873_v13, %s4707_s29 }
 0x5e2   :  { %1426 = vrot.lane.b32.xlu0 %v4869_v12, %s5375_s3 }
 0x5e6   :  { %1504 = vrot.lane.b32.xlu0 %v4873_v13, %s5375_s3  ;;  %s5399_s3 = smov 72  }
 0x5ea   :  { %1424 = vrot.lane.b32.xlu0 %v4880_v15, %s5377_s0 }
 0x651   :  { %v771_v18 = vpop.xlane.xlu0 %770 }
 0x652   :  { %4612 = vrcp.f32 %v771_v18 }
 0x655   :  { %v853_v19 = vpop.permute.xlu0 %852 }
 0x656   :  { %4307 = vmatpush3.msra.mxu0 %v853_v19 }
 0x657   :  { %4311 = vmatprep.subr.mxu0 %v174_v30 }
 0x659   :  { %v1266_v20 = vpop.permute.xlu0 %1265 }
 0x65a   :  { %4332 = vmatpush3.msra.mxu1 %v1266_v20 }
 0x65b   :  { %4341 = vmatprep.subr.mxu1 %v4698_v8 }
 0x65c   :  { %v4613_v21 = vpop.eup %4612 }
 0x65d   :  { %v775_v22 = vmul.f32 %v4613_v21, %v4611_v14  ;;  %v1427_v47 = vpop.permute.xlu0 %1426 }
 0x65e   :  { %v848_v23 = vpop.f32.mrb[10].mxu1 }
 0x65f   :  { %v4305_v24 = vpop.f32.mrb[11].mxu1  ;;  %4309 = vmatmul.mubr.msk.f32.vlgmr.msra.gmra.mrb[6].mxu0 %vm181_vm2, %v775_v22 }
 0x660   :  { %4313 = vmatprep.mubr.msk.f32.mxu0 %vm181_vm2, %v848_v23  ;;  %4312 = vmatpush3.msra.mxu0 %v174_v30 }
 0x661   :  { %4326 = vmatprep.subr.mxu0 %v4698_v8  ;;  %v1505_v50 = vpop.permute.xlu0 %1504 }
 0x662   :  { %v1085_v25 = vpop.f32.mrb[12].mxu1 }
 0x663   :  { %v4320_v26 = vpop.f32.mrb[13].mxu1  ;;  %v1167_v15 = vsel %vm181_vm2, %v1085_v25, -inf }
 0x664   :  { %1168 = vmax.xlane.f32.xlu1 %v1167_v15 }
 0x665   :  { %v1425_v52 = vpop.permute.xlu0 %1424 }
 0x666   :  { %v1163_v27 = vpop.f32.mrb[14].mxu1 }
 0x667   :  { %v4325_v28 = vpop.f32.mrb[15].mxu1  ;;  %v1170_v29 = vsel %vm181_vm2, %v1163_v27, -inf }
 0x668   :  { %1171 = vmax.xlane.f32.xlu1 %v1170_v29 }
 0x6f1   :  { %v1169_v31 = vpop.xlane.xlu1 %1168 }
 0x6f2   :  { %v1173_v32 = vsub.f32 %v1085_v25, %v1169_v31 }
 0x6f4   :  { %v1175_v33 = vmul.f32 1.442695, %v1173_v32 }
 0x6f5   :  { %v1172_v34 = vpop.xlane.xlu1 %1171 }
 0x6f6   :  { %4614 = vpow2.f32 %v1175_v33  ;;  %v1174_v35 = vsub.f32 %v1163_v27, %v1172_v34  ;;  %v4057_v27 = vld [vmem:[%s5393_s25] ss:$0 sm:$0xff] }
 0x6f8   :  { %v1177_v36 = vmul.f32 1.442695, %v1174_v35 }
 0x6fa   :  { %4616 = vpow2.f32 %v1177_v36 }
 0x700   :  { %v4615_v37 = vpop.eup %4614 }
 0x701   :  { %v1179_v38 = vsel %vm181_vm2, %v4615_v37, 0.0 }
 0x702   :  { %1180 = vadd.xlane.f32.xlu1 %v1179_v38 }
 0x704   :  { %v4617_v39 = vpop.eup %4616 }
 0x705   :  { %v1182_v40 = vsel %vm181_vm2, %v4617_v39, 0.0 }
 0x706   :  { %1183 = vadd.xlane.f32.xlu1 %v1182_v40 }
 0x717   :  { %1189 = vrot.lane.b32.xlu1 %v4869_v12, %s4707_s29 }
 0x71b   :  { %1502 = vrot.lane.b32.xlu1 %v4888_v17, %s5377_s0  ;;  %s5395_s0 = sld [smem:[#allocation11_spill]] }
 0x732   :  { %v924_v41 = vpop.f32.mrb[6].mxu0 }
 0x733   :  { %v4310_v42 = vpop.f32.mrb[7].mxu0  ;;  %4314 = vmatmul.mubr.msk.f32.vlgmr.msra.gmra.mrb[2].mxu0 %vm181_vm2, %v924_v41 }
 0x734   :  { %4328 = vmatprep.mubr.msk.f32.mxu0 %vm4699_vm1, %v4698_v8 }
 0x78f   :  { %v1181_v43 = vpop.xlane.xlu1 %1180 }
 0x790   :  { %4618 = vrcp.f32 %v1181_v43 }
 0x793   :  { %v1184_v44 = vpop.xlane.xlu1 %1183 }
 0x794   :  { %4620 = vrcp.f32 %v1184_v44 }
 0x797   :  { %v1190_v46 = vpop.permute.xlu1 %1189 }
 0x798   :  { %4327 = vmatpush3.msra.mxu0 %v1190_v46 }
 0x799   :  { %4336 = vmatprep.subr.mxu0 %v175_v45 }
 0x79a   :  { %v4619_v17 = vpop.eup %4618 }
 0x79b   :  { %v1187_v48 = vmul.f32 %v4619_v17, %v4615_v37  ;;  %v1503_v57 = vpop.permute.xlu1 %1502  ;;  %v1885_v17 = vld [vmem:[%s5355_s8 + $0x8] sm:$0xff] }
 0x79d   :  { %4329 = vmatmul.mubr.msk.f32.vlgmr.msra.gmra.mrb[8].mxu0 %vm181_vm2, %v1187_v48 }
 0x79e   :  { %v4621_v49 = vpop.eup %4620  ;;  %4337 = vmatpush3.msra.mxu0 %v175_v45  ;;  %v1979_v45 = vld [vmem:[%s5357_s10 + $0x8] sm:$0xff] }
 0x79f   :  { %v1188_v51 = vmul.f32 %v4621_v49, %v4617_v39  ;;  %4346 = vmatprep.subr.mxu0 %v4698_v8  ;;  %v1980_v49 = vld [vmem:[%s5357_s10 + $0x10] sm:$0xff] }
 0x7a1   :  { %4334 = vmatmul.mubr.msk.f32.vlgmr.msra.gmra.mrb[16].mxu1 %vm181_vm2, %v1188_v51  ;;  %v1886_v51 = vld [vmem:[%s5355_s8 + $0x10] sm:$0xff] }
 0x7a2   :  { %4342 = vmatpush3.xpose.msk.msra.mxu1 %vm181_vm2, %v1427_v47  ;;  %4343 = vmatprep.mubr.msk.f32.mxu1 %vm4699_vm1, %v4698_v8  ;;  %v1884_v47 = vld [vmem:[%s5355_s8] sm:$0xff] }
 0x7a3   :  { %4351 = vmatprep.subr.mxu1 %v4698_v8  ;;  %v4526_v48 = vpack.c.bf16 %v1885_v17, %v1884_v47 }
 0x7a5   :  { %4344 = vmatmul.mubr.msk.f32.vlgmr.msra.gmra.mrb[18].mxu1 %vm181_vm2, %v1425_v52 }
 0x7a6   :  { %4353 = vmatprep.mubr.msk.f32.mxu1 %vm4699_vm1, %v4698_v8 }
 0x870   :  { %v1261_v53 = vpop.f32.mrb[8].mxu0 }
 0x871   :  { %v4330_v54 = vpop.f32.mrb[9].mxu0  ;;  %4338 = vmatprep.mubr.msk.f32.mxu0 %vm181_vm2, %v1261_v53  ;;  %v1887_v53 = vld [vmem:[%s5355_s8 + $0x18] sm:$0xff] }
 0x872   :  { %v76_v54 = vld [vmem:[%s5394_s28] sm:$0xff] }
 0x874   :  { %v1337_v55 = vpop.f32.mrb[16].mxu1 }
 0x875   :  { %v4335_v56 = vpop.f32.mrb[17].mxu1  ;;  %4339 = vmatmul.mubr.msk.f32.vlgmr.msra.gmra.mrb[2].mxu0 %vm181_vm2, %v1337_v55  ;;  %v4530_v55 = vpack.c.bf16 %v1887_v53, %v1886_v51 }
 0x876   :  { %4347 = vmatpush3.xpose.msk.msra.mxu0 %vm181_vm2, %v1505_v50  ;;  %4348 = vmatprep.mubr.msk.f32.mxu0 %vm4699_vm1, %v4698_v8  ;;  %v1981_v50 = vld [vmem:[%s5357_s10 + $0x18] sm:$0xff]  ;;  %v77_v56 = vld [vmem:[%s5394_s28 + $0x8] sm:$0xff] }
 0x877   :  { %4356 = vmatprep.subr.mxu0 %v4698_v8  ;;  %v4538_v52 = vpack.c.bf16 %v1981_v50, %v1980_v49 }
 0x878   :  { %v1498_v58 = vpop.f32.mrb[18].mxu1 }
 0x879   :  { %v4345_v59 = vpop.f32.mrb[19].mxu1  ;;  %4349 = vmatmul.mubr.msk.f32.vlgmr.msra.gmra.mrb[10].mxu0 %vm181_vm2, %v1503_v57  ;;  %v1580_v60 = vsel %vm181_vm2, %v1498_v58, -inf }
 0x87a   :  { %1581 = vmax.xlane.f32.xlu0 %v1580_v60  ;;  %4358 = vmatprep.mubr.msk.f32.mxu0 %vm4699_vm1, %v4698_v8 }
 0x907   :  { %v1582_v61 = vpop.xlane.xlu0 %1581 }
 0x908   :  { %v1586_v62 = vsub.f32 %v1498_v58, %v1582_v61 }
 0x90a   :  { %v1588_v63 = vmul.f32 1.442695, %v1586_v62 }
 0x90c   :  { %4622 = vpow2.f32 %v1588_v63 }
 0x916   :  { %v4623_v0 = vpop.eup %4622 }
 0x917   :  { %v1592_v1 = vsel %vm181_vm2, %v4623_v0, 0.0 }
 0x918   :  { %1593 = vadd.xlane.f32.xlu0 %v1592_v1 }
 0x94c   :  { %v1576_v2 = vpop.f32.mrb[10].mxu0 }
 0x94d   :  { %v4350_v3 = vpop.f32.mrb[11].mxu0  ;;  %v1583_v4 = vsel %vm181_vm2, %v1576_v2, -inf }
 0x94e   :  { %1584 = vmax.xlane.f32.xlu1 %v1583_v4 }
 0x95f   :  { %1602 = vrot.lane.b32.xlu1 %v4869_v12, %s4710_s2  ;;  %v176_v12 = vld [vmem:[%s5392_s6 + $0x18] sm:$0xff] }
 0x9a5   :  { %v1594_v6 = vpop.xlane.xlu0 %1593 }
 0x9a6   :  { %4624 = vrcp.f32 %v1594_v6 }
 0x9b0   :  { %v4625_v10 = vpop.eup %4624 }
 0x9b1   :  { %v1600_v16 = vmul.f32 %v4625_v10, %v4623_v0  ;;  %v4082_v0 = vld [vmem:[%s5395_s0] ss:$0 sm:$0xff] }
 0x9db   :  { %v1585_v9 = vpop.xlane.xlu1 %1584 }
 0x9dc   :  { %v1587_v11 = vsub.f32 %v1576_v2, %v1585_v9 }
 0x9de   :  { %v1590_v14 = vmul.f32 1.442695, %v1587_v11 }
 0x9df   :  { %v1603_v18 = vpop.permute.xlu1 %1602 }
 0x9e0   :  { %4626 = vpow2.f32 %v1590_v14  ;;  %4352 = vmatpush3.msra.mxu1 %v1603_v18  ;;  %v4087_v14 = vld [vmem:[%s5358_s11] ss:$0 sm:$0xff] }
 0x9e1   :  { %4354 = vmatmul.mubr.msk.f32.vlgmr.msra.gmra.mrb[20].mxu1 %vm181_vm2, %v1600_v16  ;;  %4527 = vmatprep.subr.bf16.mxu1 %v4526_v48 }
 0x9e2   :  { %4529 = vmatpush3.bf16.msra.mxu1 %v4526_v48 }
 0x9e3   :  { %4531 = vmatprep.subr.bf16.mxu1 %v4530_v55 }
 0x9e6   :  { %4533 = vmatpush3.bf16.msra.mxu1 %v4530_v55 }
 0x9e7   :  { %4388 = vmatprep.subr.mxu1 %v4698_v8 }
 0x9ea   :  { %v4627_v19 = vpop.eup %4626 }
 0x9eb   :  { %v1595_v20 = vsel %vm181_vm2, %v4627_v19, 0.0 }
 0x9ec   :  { %1596 = vadd.xlane.f32.xlu0 %v1595_v20 }
 0xa02   :  { %1678 = vrot.lane.b32.xlu0 %v4873_v13, %s4710_s2  ;;  %s5396_s2 = sld [smem:[#allocation12_spill]] }
 0xa08   :  { %v4083_v4 = vld [vmem:[%s5396_s2] ss:$0 sm:$0xff] }
 0xa79   :  { %v1597_v21 = vpop.xlane.xlu0 %1596 }
 0xa7a   :  { %4628 = vrcp.f32 %v1597_v21  ;;  %v4084_v21 = vld [vmem:[%s5356_s9] ss:$0 sm:$0xff] }
 0xa7d   :  { %v1679_v22 = vpop.permute.xlu0 %1678 }
 0xa7e   :  { %4357 = vmatpush3.msra.mxu0 %v1679_v22 }
 0xa7f   :  { %4361 = vmatprep.subr.mxu0 %v176_v12 }
 0xa84   :  { %v4629_v23 = vpop.eup %4628 }
 0xa85   :  { %v1601_v24 = vmul.f32 %v4629_v23, %v4627_v19 }
 0xa87   :  { %4359 = vmatmul.mubr.msk.f32.vlgmr.msra.gmra.mrb[12].mxu0 %vm181_vm2, %v1601_v24 }
 0xa88   :  { %4362 = vmatpush3.msra.mxu0 %v176_v12 }
 0xab4   :  { %v1674_v25 = vpop.f32.mrb[20].mxu1 }
 0xab5   :  { %v4355_v26 = vpop.f32.mrb[21].mxu1  ;;  %4363 = vmatprep.mubr.msk.f32.mxu0 %vm181_vm2, %v1674_v25 }
 0xb5a   :  { %v1750_v15 = vpop.f32.mrb[12].mxu0 }
 0xb5b   :  { %v4360_v13 = vpop.f32.mrb[13].mxu0  ;;  %4364 = vmatmul.mubr.msk.f32.vlgmr.msra.gmra.mrb[2].mxu0 %vm181_vm2, %v1750_v15 }
 0xb5c   :  { %4385 = vmatprep.mubr.msk.f32.mxu0 %vm89_vm0, %v76_v54 }
 0xc2e   :  { %v4365_v28 = vpop.f32.mrb[2].mxu0 }
 0xc2f   :  { %v4566_v29 = vadd.f32 %v4365_v28, %v4057_v27  ;;  %v1826_v30 = vpop.f32.mrb[3].mxu0 }
 0xc30   :  { %v4567_v31 = vadd.f32 %v4057_v27, %v1826_v30 }
 0xc31   :  { %v1838_v32 = vadd.f32 %v4566_v29, %v4856_v7 }
 0xc32   :  { %v1837_v33 = vadd.f32 %v4567_v31, %v4849_v5  ;;  %v1978_v5 = vld [vmem:[%s5357_s10] sm:$0xff] }
 0xc33   :  { %v1844_v34 = vsel %vm89_vm0, %v1838_v32, 0.0  ;;  %v4534_v46 = vpack.c.bf16 %v1979_v45, %v1978_v5 }
 0xc34   :  { %1845 = vadd.xlane.f32.xlu0 %v1844_v34  ;;  %v1841_v35 = vsel %vm89_vm0, %v1837_v33, 0.0 }
 0xc35   :  { %1842 = vadd.xlane.f32.xlu1 %v1841_v35  ;;  %4535 = vmatprep.subr.bf16.mxu0 %v4534_v46 }
 0xc36   :  { %4537 = vmatpush3.bf16.msra.mxu0 %v4534_v46 }
 0xc37   :  { %4539 = vmatprep.subr.bf16.mxu0 %v4538_v52 }
 0xc3a   :  { %4541 = vmatpush3.bf16.msra.mxu0 %v4538_v52 }
 0xc3b   :  { %4398 = vmatprep.subr.mxu0 %v4698_v8 }
 0xc3d   :  { %4386 = vmatmul.mubr.msk.f32.vlgmr.msra.gmra.mrb[14].mxu0 %vm89_vm0, %v77_v56 }
 0xc3e   :  { %4400 = vmatprep.mubr.msk.f32.mxu0 %vm4699_vm1, %v4698_v8 }
 0xcc1   :  { %v1846_v36 = vpop.xlane.xlu0 %1845 }
 0xcc2   :  { %v1849_v37 = vmul.f32 0.03125, %v1846_v36  ;;  %v1843_v38 = vpop.xlane.xlu1 %1842 }
 0xcc3   :  { %v1848_v39 = vmul.f32 0.03125, %v1843_v38 }
 0xcc4   :  { %v1851_v40 = vsub.f32 %v1838_v32, %v1849_v37 }
 0xcc5   :  { %v1850_v41 = vsub.f32 %v1837_v33, %v1848_v39 }
 0xcc6   :  { %v1853_v42 = vmul.f32 %v1851_v40, %v1851_v40 }
 0xcc7   :  { %v1852_v43 = vmul.f32 %v1850_v41, %v1850_v41 }
 0xcc8   :  { %v1857_v44 = vsel %vm89_vm0, %v1853_v42, 0.0  ;;  %v2070_v42 = vld [vmem:[%s5359_s12] sm:$0xff] }
 0xcc9   :  { %1858 = vadd.xlane.f32.xlu0 %v1857_v44  ;;  %v1854_v7 = vsel %vm89_vm0, %v1852_v43, 0.0 }
 0xcca   :  { %1855 = vadd.xlane.f32.xlu1 %v1854_v7 }
 0xd10   :  { %v4387_v16 = vpop.f32.mrb[14].mxu0 }
 0xd11   :  { %v5087_v18 = vadd.f32 %v4387_v16, %v4087_v14  ;;  %v2061_v19 = vpop.f32.mrb[15].mxu0 }
 0xd12   :  { %v5089_v20 = vadd.f32 %v4087_v14, %v2061_v19 }
 0xd56   :  { %v1859_v57 = vpop.xlane.xlu0 %1858 }
 0xd57   :  { %v1861_v58 = vmul.f32 0.03125, %v1859_v57  ;;  %v1856_v59 = vpop.xlane.xlu1 %1855 }
 0xd58   :  { %v1860_v60 = vmul.f32 0.03125, %v1856_v59 }
 0xd59   :  { %v1863_v61 = vadd.f32 1e-05, %v1861_v58 }
 0xd5a   :  { %v1862_v62 = vadd.f32 1e-05, %v1860_v60 }
 0xd5b   :  { %4630 = vrsqrt.f32 %v1863_v61 }
 0xd5c   :  { %4632 = vrsqrt.f32 %v1862_v62 }
 0xd65   :  { %v4631_v63 = vpop.eup %4630 }
 0xd66   :  { %v4633_v1 = vpop.eup %4632  ;;  %v1867_v2 = vmul.f32 %v4631_v63, %v1851_v40 }
 0xd67   :  { %v1866_v3 = vmul.f32 %v4633_v1, %v1850_v41 }
 0xd68   :  { %v1875_v6 = vmul.f32 %v4082_v0, %v1867_v2 }
 0xd69   :  { %v1874_v9 = vmul.f32 %v4082_v0, %v1866_v3 }
 0xd6a   :  { %v5076_v11 = vadd.f32 %v4083_v4, %v1875_v6 }
 0xd6b   :  { %v5074_v10 = vadd.f32 %v4083_v4, %v1874_v9 }
 0xd6d   :  { %4374 = vmatprep.mubr.msk.f32.mxu1 %vm89_vm0, %v5074_v10 }
 0xd6e   :  { %4375 = vmatmul.mubr.msk.f32.vlgmr.msra.gmra.mrb[22].mxu1 %vm89_vm0, %v5076_v11 }
 0xd6f   :  { %4390 = vmatprep.mubr.msk.f32.mxu1 %vm4699_vm1, %v4698_v8  ;;  %4389 = vmatpush3.xpose.msk.msra.mxu1 %vm181_vm2, %v5089_v20 }
 0xd70   :  { %4393 = vmatprep.subr.mxu1 %v4698_v8 }
 0xe41   :  { %v4376_v12 = vpop.f32.mrb[22].mxu1 }
 0xe42   :  { %v1967_v22 = vpop.f32.mrb[23].mxu1  ;;  %v1973_v24 = vadd.f32 %v4376_v12, %v4084_v21 }
 0xe43   :  { %v1968_v23 = vadd.f32 %v4084_v21, %v1967_v22 }
 0xe44   :  { %v5105_v26 = vmul.f32 0.35355338, %v1973_v24 }
 0xe45   :  { %v5097_v25 = vmul.f32 0.35355338, %v1968_v23 }
 0xe47   :  { %4391 = vmatmul.mubr.msk.f32.vlgmr.msra.gmra.mrb[24].mxu1 %vm181_vm2, %v5097_v25 }
 0xe48   :  { %4394 = vmatpush3.xpose.msk.msra.mxu1 %vm181_vm2, %v5087_v18  ;;  %4395 = vmatprep.mubr.msk.f32.mxu1 %vm4699_vm1, %v4698_v8 }
 0xe49   :  { %4403 = vmatprep.subr.mxu1 %v4698_v8 }
 0xe4b   :  { %4396 = vmatmul.mubr.msk.f32.vlgmr.msra.gmra.mrb[26].mxu1 %vm181_vm2, %v5105_v26 }
 0xe4c   :  { %4405 = vmatprep.mubr.msk.f32.mxu1 %vm4699_vm1, %v4698_v8 }
 0xf1a   :  { %v2147_v15 = vpop.f32.mrb[24].mxu1 }
 0xf1b   :  { %v4392_v13 = vpop.f32.mrb[25].mxu1  ;;  %v2227_v27 = vsel %vm181_vm2, %v2147_v15, -inf }
 0xf1c   :  { %2228 = vmax.xlane.f32.xlu1 %v2227_v27 }
 0xf1e   :  { %v2223_v28 = vpop.f32.mrb[26].mxu1 }
 0xf1f   :  { %v4397_v29 = vpop.f32.mrb[27].mxu1  ;;  %v2230_v30 = vsel %vm181_vm2, %v2223_v28, -inf }
 0xf20   :  { %2231 = vmax.xlane.f32.xlu0 %v2230_v30 }
 0xfa9   :  { %v2229_v31 = vpop.xlane.xlu1 %2228 }
 0xfaa   :  { %v2233_v32 = vsub.f32 %v2147_v15, %v2229_v31 }
 0xfac   :  { %v2235_v33 = vmul.f32 1.442695, %v2233_v32 }
 0xfad   :  { %v2232_v34 = vpop.xlane.xlu0 %2231 }
 0xfae   :  { %4634 = vpow2.f32 %v2235_v33  ;;  %v2234_v35 = vsub.f32 %v2223_v28, %v2232_v34 }
 0xfb0   :  { %v2237_v36 = vmul.f32 1.442695, %v2234_v35 }
 0xfb2   :  { %4636 = vpow2.f32 %v2237_v36 }
 0xfb8   :  { %v4635_v37 = vpop.eup %4634 }
 0xfb9   :  { %v2239_v38 = vsel %vm181_vm2, %v4635_v37, 0.0 }
 0xfba   :  { %2240 = vadd.xlane.f32.xlu1 %v2239_v38 }
 0xfbc   :  { %v4637_v39 = vpop.eup %4636 }
 0xfbd   :  { %v2242_v40 = vsel %vm181_vm2, %v4637_v39, 0.0 }
 0xfbe   :  { %2243 = vadd.xlane.f32.xlu0 %v2242_v40 }
 0xfcb   :  { %2251 = vrot.lane.b32.xlu1 %v5089_v20, %s4700_s24 }
 0xfcf   :  { %2494 = vrot.lane.b32.xlu1 %v5089_v20, %s4703_s1 }
 0xfd3   :  { %2492 = vrot.lane.b32.xlu1 %v5097_v25, %s4703_s1 }
 0xfd4   :  { %2327 = vrot.lane.b32.xlu0 %v5087_v18, %s4700_s24  ;;  %s5397_s24 = smov 80  }
 0xfd7   :  { %2570 = vrot.lane.b32.xlu1 %v5105_v26, %s4703_s1 }
 0xfd8   :  { %2572 = vrot.lane.b32.xlu0 %v5087_v18, %s4703_s1  ;;  %s5398_s1 = smov 104  }
 0xfdb   :  { %2909 = vrot.lane.b32.xlu1 %v5089_v20, %s4705_s7 }
0x1047   :  { %v2241_v41 = vpop.xlane.xlu1 %2240 }
0x1048   :  { %4638 = vrcp.f32 %v2241_v41 }
0x104b   :  { %v2252_v43 = vpop.permute.xlu1 %2251  ;;  %v2244_v44 = vpop.xlane.xlu0 %2243 }
0x104c   :  { %4640 = vrcp.f32 %v2244_v44  ;;  %4399 = vmatpush3.msra.mxu0 %v2252_v43 }
0x104d   :  { %4408 = vmatprep.subr.mxu0 %v2070_v42 }
0x104f   :  { %v2328_v7 = vpop.permute.xlu0 %2327  ;;  %v2495_v47 = vpop.permute.xlu1 %2494 }
0x1050   :  { %4404 = vmatpush3.msra.mxu1 %v2328_v7 }
0x1051   :  { %4413 = vmatprep.subr.mxu1 %v4698_v8 }
0x1052   :  { %v4639_v5 = vpop.eup %4638 }
0x1053   :  { %v5134_v45 = vmul.f32 %v4639_v5, %v4635_v37  ;;  %v2493_v48 = vpop.permute.xlu1 %2492  ;;  %v2573_v52 = vpop.permute.xlu0 %2572  ;;  %v2071_v37 = vld [vmem:[%s5359_s12 + $0x8] sm:$0xff] }
0x1055   :  { %4401 = vmatmul.mubr.msk.f32.vlgmr.msra.gmra.mrb[16].mxu0 %vm181_vm2, %v5134_v45 }
0x1056   :  { %v4641_v46 = vpop.eup %4640  ;;  %4409 = vmatpush3.msra.mxu0 %v2070_v42 }
0x1057   :  { %v5138_v17 = vmul.f32 %v4641_v46, %v4637_v39  ;;  %4418 = vmatprep.subr.mxu0 %v4698_v8  ;;  %v2571_v54 = vpop.permute.xlu1 %2570 }
0x1059   :  { %4406 = vmatmul.mubr.msk.f32.vlgmr.msra.gmra.mrb[28].mxu1 %vm181_vm2, %v5138_v17 }
0x105a   :  { %4414 = vmatpush3.xpose.msk.msra.mxu1 %vm181_vm2, %v2495_v47  ;;  %4415 = vmatprep.mubr.msk.f32.mxu1 %vm4699_vm1, %v4698_v8 }
0x105b   :  { %4423 = vmatprep.subr.mxu1 %v4698_v8  ;;  %v2910_v3 = vpop.permute.xlu1 %2909 }
0x105d   :  { %4416 = vmatmul.mubr.msk.f32.vlgmr.msra.gmra.mrb[30].mxu1 %vm181_vm2, %v2493_v48 }
0x105e   :  { %4425 = vmatprep.mubr.msk.f32.mxu1 %vm4699_vm1, %v4698_v8 }
0x1128   :  { %v2323_v49 = vpop.f32.mrb[16].mxu0 }
0x1129   :  { %v4402_v50 = vpop.f32.mrb[17].mxu0  ;;  %4410 = vmatprep.mubr.msk.f32.mxu0 %vm181_vm2, %v2323_v49 }
0x112c   :  { %v2399_v51 = vpop.f32.mrb[28].mxu1 }
0x112d   :  { %v4407_v53 = vpop.f32.mrb[29].mxu1  ;;  %4411 = vmatmul.mubr.msk.f32.vlgmr.msra.gmra.mrb[18].mxu0 %vm181_vm2, %v2399_v51  ;;  %v2072_v51 = vld [vmem:[%s5359_s12 + $0x10] sm:$0xff] }
0x112e   :  { %4419 = vmatpush3.xpose.msk.msra.mxu0 %vm181_vm2, %v2573_v52  ;;  %4420 = vmatprep.mubr.msk.f32.mxu0 %vm4699_vm1, %v4698_v8 }
0x112f   :  { %4428 = vmatprep.subr.mxu0 %v4698_v8 }
0x1130   :  { %v2566_v55 = vpop.f32.mrb[30].mxu1 }
0x1131   :  { %v4417_v56 = vpop.f32.mrb[31].mxu1  ;;  %4421 = vmatmul.mubr.msk.f32.vlgmr.msra.gmra.mrb[20].mxu0 %vm181_vm2, %v2571_v54  ;;  %v2648_v57 = vsel %vm181_vm2, %v2566_v55, -inf }
0x1132   :  { %2649 = vmax.xlane.f32.xlu0 %v2648_v57  ;;  %4430 = vmatprep.mubr.msk.f32.mxu0 %vm4699_vm1, %v4698_v8 }
0x1148   :  { %2672 = vrot.lane.b32.xlu0 %v5089_v20, %s4702_s5 }
0x114c   :  { %2907 = vrot.lane.b32.xlu0 %v5097_v25, %s4705_s7 }
0x1150   :  { %2985 = vrot.lane.b32.xlu0 %v5105_v26, %s4705_s7 }
0x11bf   :  { %v2650_v58 = vpop.xlane.xlu0 %2649 }
0x11c0   :  { %v2654_v59 = vsub.f32 %v2566_v55, %v2650_v58 }
0x11c2   :  { %v2656_v60 = vmul.f32 1.442695, %v2654_v59 }
0x11c3   :  { %v2673_v61 = vpop.permute.xlu0 %2672 }
0x11c4   :  { %4642 = vpow2.f32 %v2656_v60  ;;  %4424 = vmatpush3.msra.mxu1 %v2673_v61 }
0x11c5   :  { %4438 = vmatprep.subr.mxu1 %v4698_v8 }
0x11c7   :  { %v2908_v14 = vpop.permute.xlu0 %2907 }
0x11cb   :  { %v2986_v19 = vpop.permute.xlu0 %2985 }
0x11ce   :  { %v4643_v62 = vpop.eup %4642 }
0x11cf   :  { %v2660_v63 = vsel %vm181_vm2, %v4643_v62, 0.0 }
0x11d0   :  { %2661 = vadd.xlane.f32.xlu1 %v2660_v63 }
0x11e1   :  { %2987 = vrot.lane.b32.xlu1 %v5087_v18, %s4705_s7 }
0x1204   :  { %v2644_v0 = vpop.f32.mrb[20].mxu0 }
0x1205   :  { %v4422_v1 = vpop.f32.mrb[21].mxu0  ;;  %v2651_v2 = vsel %vm181_vm2, %v2644_v0, -inf }
0x1206   :  { %2652 = vmax.xlane.f32.xlu1 %v2651_v2 }
0x125d   :  { %v2662_v4 = vpop.xlane.xlu1 %2661 }
0x125e   :  { %4644 = vrcp.f32 %v2662_v4 }
0x1261   :  { %v2988_v16 = vpop.permute.xlu1 %2987 }
0x1268   :  { %v4645_v6 = vpop.eup %4644 }
0x1269   :  { %v5171_v9 = vmul.f32 %v4645_v6, %v4643_v62 }
0x126b   :  { %4426 = vmatmul.mubr.msk.f32.vlgmr.msra.gmra.mrb[32].mxu1 %vm181_vm2, %v5171_v9  ;;  %v2670_v54 = vadd.f32 %v5171_v9, %v5134_v45 }
0x126c   :  { %4439 = vmatpush3.xpose.msk.msra.mxu1 %vm181_vm2, %v2910_v3  ;;  %4440 = vmatprep.mubr.msk.f32.mxu1 %vm4699_vm1, %v4698_v8 }
0x126d   :  { %4443 = vmatprep.subr.mxu1 %v4698_v8 }
0x126f   :  { %4441 = vmatmul.mubr.msk.f32.vlgmr.msra.gmra.mrb[34].mxu1 %vm181_vm2, %v2908_v14 }
0x1270   :  { %4444 = vmatpush3.xpose.msk.msra.mxu1 %vm181_vm2, %v2988_v16  ;;  %4445 = vmatprep.mubr.msk.f32.mxu1 %vm4699_vm1, %v4698_v8 }
0x1271   :  { %4453 = vmatprep.subr.mxu1 %v4698_v8 }
0x1273   :  { %4446 = vmatmul.mubr.msk.f32.vlgmr.msra.gmra.mrb[36].mxu1 %vm181_vm2, %v2986_v19 }
0x1274   :  { %4455 = vmatprep.mubr.msk.f32.mxu1 %vm4699_vm1, %v4698_v8 }
0x1293   :  { %v2653_v21 = vpop.xlane.xlu1 %2652 }
0x1294   :  { %v2655_v12 = vsub.f32 %v2644_v0, %v2653_v21 }
0x1296   :  { %v2658_v22 = vmul.f32 1.442695, %v2655_v12 }
0x1298   :  { %4646 = vpow2.f32 %v2658_v22 }
0x12a2   :  { %v4647_v23 = vpop.eup %4646 }
0x12a3   :  { %v2663_v24 = vsel %vm181_vm2, %v4647_v23, 0.0 }
0x12a4   :  { %2664 = vadd.xlane.f32.xlu0 %v2663_v24 }
0x12ba   :  { %2748 = vrot.lane.b32.xlu0 %v5087_v18, %s4702_s5 }
0x12be   :  { %3163 = vrot.lane.b32.xlu0 %v5087_v18, %s5397_s24 }
0x12c2   :  { %3324 = vrot.lane.b32.xlu0 %v5089_v20, %s5398_s1 }
0x12c6   :  { %3402 = vrot.lane.b32.xlu0 %v5087_v18, %s5398_s1 }
0x12ca   :  { %3322 = vrot.lane.b32.xlu0 %v5097_v25, %s5398_s1 }
0x1331   :  { %v2665_v15 = vpop.xlane.xlu0 %2664 }
0x1332   :  { %4648 = vrcp.f32 %v2665_v15 }
0x1335   :  { %v2749_v13 = vpop.permute.xlu0 %2748 }
0x1336   :  { %4429 = vmatpush3.msra.mxu0 %v2749_v13 }
0x1337   :  { %4433 = vmatprep.subr.mxu0 %v2071_v37 }
0x1339   :  { %v3164_v27 = vpop.permute.xlu0 %3163 }
0x133a   :  { %4454 = vmatpush3.msra.mxu1 %v3164_v27 }
0x133b   :  { %4463 = vmatprep.subr.mxu1 %v4698_v8 }
0x133c   :  { %v4649_v28 = vpop.eup %4648 }
0x133d   :  { %v2669_v29 = vmul.f32 %v4649_v28, %v4647_v23  ;;  %v3325_v53 = vpop.permute.xlu0 %3324 }
0x133e   :  { %v2744_v30 = vpop.f32.mrb[32].mxu1 }
0x133f   :  { %v4427_v31 = vpop.f32.mrb[33].mxu1  ;;  %4431 = vmatmul.mubr.msk.f32.vlgmr.msra.gmra.mrb[22].mxu0 %vm181_vm2, %v2669_v29  ;;  %v2671_v59 = vadd.f32 %v2669_v29, %v5138_v17 }
0x1340   :  { %4435 = vmatprep.mubr.msk.f32.mxu0 %vm181_vm2, %v2744_v30  ;;  %4434 = vmatpush3.msra.mxu0 %v2071_v37 }
0x1341   :  { %4448 = vmatprep.subr.mxu0 %v4698_v8  ;;  %v3403_v58 = vpop.permute.xlu0 %3402 }
0x1342   :  { %v2981_v32 = vpop.f32.mrb[34].mxu1 }
0x1343   :  { %v4442_v33 = vpop.f32.mrb[35].mxu1  ;;  %v3063_v25 = vsel %vm181_vm2, %v2981_v32, -inf }
0x1344   :  { %3064 = vmax.xlane.f32.xlu1 %v3063_v25  ;;  %v2073_v33 = vld [vmem:[%s5359_s12 + $0x18] sm:$0xff] }
0x1345   :  { %v3323_v45 = vpop.permute.xlu0 %3322 }
0x1346   :  { %v3059_v34 = vpop.f32.mrb[36].mxu1 }
0x1347   :  { %v4447_v35 = vpop.f32.mrb[37].mxu1  ;;  %v3066_v36 = vsel %vm181_vm2, %v3059_v34, -inf }
0x1348   :  { %3067 = vmax.xlane.f32.xlu1 %v3066_v36 }
0x13d1   :  { %v3065_v38 = vpop.xlane.xlu1 %3064 }
0x13d2   :  { %v3069_v39 = vsub.f32 %v2981_v32, %v3065_v38 }
0x13d4   :  { %v3071_v40 = vmul.f32 1.442695, %v3069_v39 }
0x13d5   :  { %v3068_v41 = vpop.xlane.xlu1 %3067 }
0x13d6   :  { %4650 = vpow2.f32 %v3071_v40  ;;  %v3070_v42 = vsub.f32 %v3059_v34, %v3068_v41  ;;  %v4098_v41 = vld [vmem:[%s5360_s13] ss:$0 sm:$0xff] }
0x13d8   :  { %v3073_v43 = vmul.f32 1.442695, %v3070_v42 }
0x13da   :  { %4652 = vpow2.f32 %v3073_v43 }
0x13e0   :  { %v4651_v44 = vpop.eup %4650 }
0x13e1   :  { %v3075_v7 = vsel %vm181_vm2, %v4651_v44, 0.0 }
0x13e2   :  { %3076 = vadd.xlane.f32.xlu1 %v3075_v7 }
0x13e4   :  { %v4653_v5 = vpop.eup %4652 }
0x13e5   :  { %v3078_v46 = vsel %vm181_vm2, %v4653_v5, 0.0 }
0x13e6   :  { %3079 = vadd.xlane.f32.xlu1 %v3078_v46 }
0x13f7   :  { %3087 = vrot.lane.b32.xlu1 %v5089_v20, %s5397_s24 }
0x13fb   :  { %3400 = vrot.lane.b32.xlu1 %v5105_v26, %s5398_s1 }
0x1412   :  { %v2820_v47 = vpop.f32.mrb[22].mxu0 }
0x1413   :  { %v4432_v48 = vpop.f32.mrb[23].mxu0  ;;  %4436 = vmatmul.mubr.msk.f32.vlgmr.msra.gmra.mrb[18].mxu0 %vm181_vm2, %v2820_v47 }
0x1414   :  { %4450 = vmatprep.mubr.msk.f32.mxu0 %vm4699_vm1, %v4698_v8 }
0x146f   :  { %v3077_v49 = vpop.xlane.xlu1 %3076 }
0x1470   :  { %4654 = vrcp.f32 %v3077_v49 }
0x1473   :  { %v3080_v50 = vpop.xlane.xlu1 %3079 }
0x1474   :  { %4656 = vrcp.f32 %v3080_v50 }
0x1477   :  { %v3088_v52 = vpop.permute.xlu1 %3087 }
0x1478   :  { %4449 = vmatpush3.msra.mxu0 %v3088_v52 }
0x1479   :  { %4458 = vmatprep.subr.mxu0 %v2072_v51 }
0x147a   :  { %v4655_v26 = vpop.eup %4654 }
0x147b   :  { %v3083_v55 = vmul.f32 %v4655_v26, %v4651_v44  ;;  %v3401_v1 = vpop.permute.xlu1 %3400 }
0x147d   :  { %4451 = vmatmul.mubr.msk.f32.vlgmr.msra.gmra.mrb[24].mxu0 %vm181_vm2, %v3083_v55  ;;  %v3085_v56 = vadd.f32 %v3083_v55, %v2670_v54 }
0x147e   :  { %v4657_v57 = vpop.eup %4656  ;;  %4459 = vmatpush3.msra.mxu0 %v2072_v51 }
0x147f   :  { %v3084_v60 = vmul.f32 %v4657_v57, %v4653_v5  ;;  %4468 = vmatprep.subr.mxu0 %v4698_v8  ;;  %v3788_v57 = vld [vmem:[%s5363_s16 + $0x8] sm:$0xff] }
0x1481   :  { %4456 = vmatmul.mubr.msk.f32.vlgmr.msra.gmra.mrb[38].mxu1 %vm181_vm2, %v3084_v60  ;;  %v3086_v61 = vadd.f32 %v3084_v60, %v2671_v59  ;;  %v3789_v59 = vld [vmem:[%s5363_s16 + $0x10] sm:$0xff]  ;;  %v3790_v60 = vld [vmem:[%s5363_s16 + $0x18] sm:$0xff] }
0x1482   :  { %4464 = vmatpush3.xpose.msk.msra.mxu1 %vm181_vm2, %v3325_v53  ;;  %4465 = vmatprep.mubr.msk.f32.mxu1 %vm4699_vm1, %v4698_v8 }
0x1483   :  { %4473 = vmatprep.subr.mxu1 %v4698_v8 }
0x1485   :  { %4466 = vmatmul.mubr.msk.f32.vlgmr.msra.gmra.mrb[40].mxu1 %vm181_vm2, %v3323_v45  ;;  %v3881_v45 = vld [vmem:[%s5365_s18] sm:$0xff] }
0x1486   :  { %4475 = vmatprep.mubr.msk.f32.mxu1 %vm4699_vm1, %v4698_v8 }
0x1550   :  { %v3159_v17 = vpop.f32.mrb[24].mxu0 }
0x1551   :  { %v4452_v62 = vpop.f32.mrb[25].mxu0  ;;  %4460 = vmatprep.mubr.msk.f32.mxu0 %vm181_vm2, %v3159_v17  ;;  %v3882_v17 = vld [vmem:[%s5365_s18 + $0x8] sm:$0xff] }
0x1552   :  { %v3883_v62 = vld [vmem:[%s5365_s18 + $0x10] sm:$0xff] }
0x1554   :  { %v3235_v63 = vpop.f32.mrb[38].mxu1 }
0x1555   :  { %v4457_v0 = vpop.f32.mrb[39].mxu1  ;;  %4461 = vmatmul.mubr.msk.f32.vlgmr.msra.gmra.mrb[18].mxu0 %vm181_vm2, %v3235_v63  ;;  %v4550_v63 = vpack.c.bf16 %v3882_v17, %v3881_v45 }
0x1556   :  { %4469 = vmatpush3.xpose.msk.msra.mxu0 %vm181_vm2, %v3403_v58  ;;  %4470 = vmatprep.mubr.msk.f32.mxu0 %vm4699_vm1, %v4698_v8  ;;  %v3884_v0 = vld [vmem:[%s5365_s18 + $0x18] sm:$0xff] }
0x1557   :  { %4478 = vmatprep.subr.mxu0 %v4698_v8 }
0x1558   :  { %v3396_v2 = vpop.f32.mrb[40].mxu1 }
0x1559   :  { %v4467_v3 = vpop.f32.mrb[41].mxu1  ;;  %4471 = vmatmul.mubr.msk.f32.vlgmr.msra.gmra.mrb[26].mxu0 %vm181_vm2, %v3401_v1  ;;  %v3478_v4 = vsel %vm181_vm2, %v3396_v2, -inf  ;;  %v4554_v1 = vpack.c.bf16 %v3884_v0, %v3883_v62 }
0x155a   :  { %3479 = vmax.xlane.f32.xlu0 %v3478_v4  ;;  %4480 = vmatprep.mubr.msk.f32.mxu0 %vm4699_vm1, %v4698_v8  ;;  %v3886_v3 = vld [vmem:[%s5365_s18 + $0x28] sm:$0xff] }
0x15e7   :  { %v3480_v6 = vpop.xlane.xlu0 %3479 }
0x15e8   :  { %v3484_v9 = vsub.f32 %v3396_v2, %v3480_v6  ;;  %v3885_v2 = vld [vmem:[%s5365_s18 + $0x20] sm:$0xff] }
0x15e9   :  { %v4558_v4 = vpack.c.bf16 %v3886_v3, %v3885_v2 }
0x15ea   :  { %v3486_v14 = vmul.f32 1.442695, %v3484_v9 }
0x15ec   :  { %4658 = vpow2.f32 %v3486_v14 }
0x15f6   :  { %v4659_v16 = vpop.eup %4658 }
0x15f7   :  { %v3490_v19 = vsel %vm181_vm2, %v4659_v16, 0.0 }
0x15f8   :  { %3491 = vadd.xlane.f32.xlu0 %v3490_v19 }
0x162c   :  { %v3474_v21 = vpop.f32.mrb[26].mxu0 }
0x162d   :  { %v4472_v12 = vpop.f32.mrb[27].mxu0  ;;  %v3481_v22 = vsel %vm181_vm2, %v3474_v21, -inf }
0x162e   :  { %3482 = vmax.xlane.f32.xlu1 %v3481_v22  ;;  %v4123_v22 = vld [vmem:[%s5361_s14] ss:$0 sm:$0xff] }
0x163f   :  { %3502 = vrot.lane.b32.xlu1 %v5089_v20, %s5399_s3 }
0x1685   :  { %v3492_v23 = vpop.xlane.xlu0 %3491 }
0x1686   :  { %4660 = vrcp.f32 %v3492_v23 }
0x1690   :  { %v4661_v24 = vpop.eup %4660 }
0x1691   :  { %v3498_v8 = vmul.f32 %v4661_v24, %v4659_v16 }
0x1693   :  { %v3500_v15 = vadd.f32 %v3498_v8, %v3085_v56 }
0x1695   :  { %v3783_v13 = vmul.f32 0.25, %v3500_v15  ;;  %v4124_v15 = vld [vmem:[%s5362_s15] ss:$0 sm:$0xff] }
0x1697   :  { %3785 = vst.msk [vmem:[#allocation2] sm:$0xff] %vm181_vm2, %v3783_v13 }
0x16bb   :  { %v3483_v27 = vpop.xlane.xlu1 %3482 }
0x16bc   :  { %v3485_v28 = vsub.f32 %v3474_v21, %v3483_v27 }
0x16be   :  { %v3488_v29 = vmul.f32 1.442695, %v3485_v28 }
0x16bf   :  { %v3503_v30 = vpop.permute.xlu1 %3502 }
0x16c0   :  { %4662 = vpow2.f32 %v3488_v29  ;;  %4474 = vmatpush3.msra.mxu1 %v3503_v30  ;;  %v3887_v30 = vld [vmem:[%s5365_s18 + $0x30] sm:$0xff] }
0x16c1   :  { %4476 = vmatmul.mubr.msk.f32.vlgmr.msra.gmra.mrb[42].mxu1 %vm181_vm2, %v3498_v8 }
0x16ca   :  { %v4663_v31 = vpop.eup %4662 }
0x16cb   :  { %v3493_v32 = vsel %vm181_vm2, %v4663_v31, 0.0 }
0x16cc   :  { %3494 = vadd.xlane.f32.xlu0 %v3493_v32 }
0x16e2   :  { %3578 = vrot.lane.b32.xlu0 %v5087_v18, %s5399_s3 }
0x1759   :  { %v3495_v20 = vpop.xlane.xlu0 %3494 }
0x175a   :  { %4664 = vrcp.f32 %v3495_v20  ;;  %v4125_v20 = vld [vmem:[%s5364_s17] ss:$0 sm:$0xff]  ;;  %s4711_s17 = smov [#allocation2]  }
0x175d   :  { %v3579_v25 = vpop.permute.xlu0 %3578 }
0x175e   :  { %4479 = vmatpush3.msra.mxu0 %v3579_v25 }
0x175f   :  { %4483 = vmatprep.subr.mxu0 %v2073_v33 }
0x1764   :  { %v4665_v34 = vpop.eup %4664 }
0x1765   :  { %v3499_v35 = vmul.f32 %v4665_v34, %v4663_v31  ;;  %v3888_v31 = vld [vmem:[%s5365_s18 + $0x38] sm:$0xff]  ;;  %s4033_s18 = sshll.u32 %s4711_s17, 4  ;;  %s4034_s18 = int_to_ptr.vmem [resolvable:$true] %s4033_s18 }
0x1766   :  { %v4562_v32 = vpack.c.bf16 %v3888_v31, %v3887_v30  ;;  %p4679_p1 = scmp.lt.s32.totalorder %s4034_s18, %s4034_s18 }
0x1767   :  { %4481 = vmatmul.mubr.msk.f32.vlgmr.msra.gmra.mrb[28].mxu0 %vm181_vm2, %v3499_v35  ;;  %v3501_v36 = vadd.f32 %v3499_v35, %v3086_v61  ;;  %v4546_v61 = vpack.c.bf16 %v3790_v60, %v3789_v59 }
0x1768   :  { %4484 = vmatpush3.msra.mxu0 %v2073_v33 }
0x1769   :  { %v3784_v37 = vmul.f32 0.25, %v3501_v36  ;;  %4551 = vmatprep.subr.bf16.mxu0 %v4550_v63 }
0x176b   :  { %3786 = vst.msk [vmem:[#allocation2 + $0x8] sm:$0xff] %vm181_vm2, %v3784_v37 }
0x1794   :  { %v3574_v38 = vpop.f32.mrb[42].mxu1 }
0x1795   :  { %v4477_v18 = vpop.f32.mrb[43].mxu1  ;;  %4485 = vmatprep.mubr.msk.f32.mxu0 %vm181_vm2, %v3574_v38  ;;  %v4128_v38 = vld [vmem:[%s5366_s19] ss:$0 sm:$0xff]  ;;  %s4674_s19 = scalar_lea.vmem %s4034_s18, 256 }
0x1796   :  { %p4675_p0 = scmp.ne.s32.totalorder %s4034_s18, %s4674_s19  ;;  %p4680_p2 = scmp.lt.s32.totalorder %s4674_s19, %s4674_s19 }
0x1798   :  { %p4681_p3 = por %p4680_p2, %p4679_p1 }
0x179a   :  { %p4682_p4 = pnand %p4681_p3, %p4675_p0 }
0x183a   :  { %v3650_v39 = vpop.f32.mrb[28].mxu0 }
0x183b   :  { %v4482_v40 = vpop.f32.mrb[29].mxu0  ;;  %4486 = vmatmul.mubr.msk.f32.vlgmr.msra.gmra.mrb[18].mxu0 %vm181_vm2, %v3650_v39 }
0x183c   :  { %4553 = vmatpush3.bf16.msra.mxu0 %v4550_v63 }
0x183d   :  { %4555 = vmatprep.subr.bf16.mxu0 %v4554_v1 }
0x1840   :  { %4557 = vmatpush3.bf16.msra.mxu0 %v4554_v1 }
0x1841   :  { %4559 = vmatprep.subr.bf16.mxu0 %v4558_v4 }
0x1844   :  { %4561 = vmatpush3.bf16.msra.mxu0 %v4558_v4 }
0x1845   :  { %4563 = vmatprep.subr.bf16.mxu0 %v4562_v32 }
0x1848   :  { %4565 = vmatpush3.bf16.msra.mxu0 %v4562_v32 }
0x190e   :  { %v4487_v42 = vpop.f32.mrb[18].mxu0 }
0x190f   :  { %v4568_v43 = vadd.f32 %v4487_v42, %v4098_v41  ;;  %v3726_v44 = vpop.f32.mrb[19].mxu0 }
0x1910   :  { %v4569_v7 = vadd.f32 %v4098_v41, %v3726_v44 }
0x1911   :  { %v3738_v5 = vadd.f32 %v4568_v43, %v5076_v11 }
0x1912   :  { %v3737_v46 = vadd.f32 %v4569_v7, %v5074_v10  ;;  %v3787_v10 = vld [vmem:[%s5363_s16] sm:$0xff] }
0x1913   :  { %v3744_v47 = vsel %vm89_vm0, %v3738_v5, 0.0  ;;  %v4542_v58 = vpack.c.bf16 %v3788_v57, %v3787_v10 }
0x1914   :  { %3745 = vadd.xlane.f32.xlu0 %v3744_v47  ;;  %v3741_v48 = vsel %vm89_vm0, %v3737_v46, 0.0 }
0x1915   :  { %3742 = vadd.xlane.f32.xlu1 %v3741_v48  ;;  %4543 = vmatprep.subr.bf16.mxu1 %v4542_v58 }
0x1916   :  { %4545 = vmatpush3.bf16.msra.mxu1 %v4542_v58 }
0x1917   :  { %4547 = vmatprep.subr.bf16.mxu1 %v4546_v61 }
0x191a   :  { %4549 = vmatpush3.bf16.msra.mxu1 %v4546_v61 }
0x19a1   :  { %v3746_v49 = vpop.xlane.xlu0 %3745 }
0x19a2   :  { %v3748_v50 = vmul.f32 0.03125, %v3746_v49  ;;  %v3743_v51 = vpop.xlane.xlu1 %3742 }
0x19a3   :  { %v3747_v52 = vmul.f32 0.03125, %v3743_v51 }
0x19a4   :  { %v3750_v53 = vsub.f32 %v3738_v5, %v3748_v50 }
0x19a5   :  { %v3749_v26 = vsub.f32 %v3737_v46, %v3747_v52 }
0x19a6   :  { %v3752_v54 = vmul.f32 %v3750_v53, %v3750_v53 }
0x19a7   :  { %v3751_v55 = vmul.f32 %v3749_v26, %v3749_v26 }
0x19a8   :  { %v3756_v56 = vsel %vm89_vm0, %v3752_v54, 0.0 }
0x19a9   :  { %3757 = vadd.xlane.f32.xlu0 %v3756_v56  ;;  %v3753_v11 = vsel %vm89_vm0, %v3751_v55, 0.0 }
0x19aa   :  { %3754 = vadd.xlane.f32.xlu1 %v3753_v11 }
0x1a36   :  { %v3758_v6 = vpop.xlane.xlu0 %3757 }
0x1a37   :  { %v3760_v9 = vmul.f32 0.03125, %v3758_v6  ;;  %v3755_v14 = vpop.xlane.xlu1 %3754 }
0x1a38   :  { %v3759_v16 = vmul.f32 0.03125, %v3755_v14 }
0x1a39   :  { %v3762_v19 = vadd.f32 1e-05, %v3760_v9 }
0x1a3a   :  { %v3761_v21 = vadd.f32 1e-05, %v3759_v16 }
0x1a3b   :  { %4666 = vrsqrt.f32 %v3762_v19 }
0x1a3c   :  { %4668 = vrsqrt.f32 %v3761_v21 }
0x1a45   :  { %v4667_v12 = vpop.eup %4666 }
0x1a46   :  { %v4669_v23 = vpop.eup %4668  ;;  %v3766_v24 = vmul.f32 %v4667_v12, %v3750_v53 }
0x1a47   :  { %v3765_v8 = vmul.f32 %v4669_v23, %v3749_v26 }
0x1a48   :  { %v3774_v13 = vmul.f32 %v4123_v22, %v3766_v24 }
0x1a49   :  { %v3773_v27 = vmul.f32 %v4123_v22, %v3765_v8 }
0x1a4a   :  { %v3782_v29 = vadd.f32 %v4124_v15, %v3774_v13 }
0x1a4b   :  { %v3781_v28 = vadd.f32 %v4124_v15, %v3773_v27 }
0x1a4d   :  { %4496 = vmatprep.mubr.msk.f32.mxu1 %vm89_vm0, %v3781_v28 }
0x1a4e   :  { %4497 = vmatmul.mubr.msk.f32.vlgmr.msra.gmra.mrb[44].mxu1 %vm89_vm0, %v3782_v29 }
0x1b21   :  { %v4498_v33 = vpop.f32.mrb[44].mxu1 }
0x1b22   :  { %v3876_v25 = vadd.f32 %v4498_v33, %v4125_v20  ;;  %v3870_v34 = vpop.f32.mrb[45].mxu1 }
0x1b23   :  { %v3871_v35 = vadd.f32 %v4125_v20, %v3870_v34 }
0x1b24   :  { %v3880_v37 = vmax.f32 %v3876_v25, 0.0 }
0x1b25   :  { %v3879_v36 = vmax.f32 %v3871_v35, 0.0 }
0x1b27   :  { %4515 = vmatprep.mubr.msk.f32.mxu0 %vm3896_vm3, %v3879_v36 }
0x1b28   :  { %4516 = vmatmul.mubr.msk.f32.vlgmr.msra.gmra.mrb[30].mxu0 %vm3896_vm3, %v3880_v37 }
0x1bfb   :  { %v4517_v18 = vpop.f32.mrb[30].mxu0 }
0x1bfc   :  { %v3975_v39 = vadd.f32 %v4517_v18, %v4128_v38  ;;  %v3969_v40 = vpop.f32.mrb[31].mxu0 }
0x1bfd   :  { %v3970_v41 = vadd.f32 %v4128_v38, %v3969_v40 }
0x1bfe   :  { %v3979_v42 = vadd.f32 %v3975_v39, %v3782_v29 }
0x1bff   :  { %v3978_v43 = vadd.f32 %v3970_v41, %v3781_v28 }
0x1c00   :  { %v3985_v44 = vsel %vm89_vm0, %v3979_v42, 0.0 }
0x1c01   :  { %3986 = vadd.xlane.f32.xlu0 %v3985_v44  ;;  %v3982_v7 = vsel %vm89_vm0, %v3978_v43, 0.0 }
0x1c02   :  { %3983 = vadd.xlane.f32.xlu1 %v3982_v7 }
0x1c8e   :  { %v3987_v5 = vpop.xlane.xlu0 %3986 }
0x1c8f   :  { %v3989_v46 = vmul.f32 0.03125, %v3987_v5  ;;  %v3984_v47 = vpop.xlane.xlu1 %3983 }
0x1c90   :  { %v3988_v48 = vmul.f32 0.03125, %v3984_v47 }
0x1c91   :  { %v3991_v49 = vsub.f32 %v3979_v42, %v3989_v46 }
0x1c92   :  { %v3990_v50 = vsub.f32 %v3978_v43, %v3988_v48 }
0x1c93   :  { %v3993_v51 = vmul.f32 %v3991_v49, %v3991_v49 }
0x1c94   :  { %v3992_v52 = vmul.f32 %v3990_v50, %v3990_v50 }
0x1c95   :  { %v3997_v53 = vsel %vm89_vm0, %v3993_v51, 0.0 }
0x1c96   :  { %3998 = vadd.xlane.f32.xlu0 %v3997_v53  ;;  %v3994_v26 = vsel %vm89_vm0, %v3992_v52, 0.0 }
0x1c97   :  { %3995 = vadd.xlane.f32.xlu1 %v3994_v26 }
0x1c98   :  { %4685 = shalt.err (!%p4682_p4)
}
0x1c99   :  { %s4686_s24 = scalar_lea.hbm %s5370_s23, 256 }
0x1c9a   :  { %p4687_p5 = scmp.ne.s32.totalorder %s5370_s23, %s4686_s24  ;;  %p4690_p6 = scmp.lt.u32.totalorder %s4686_s24, %s5370_s23 }
0x1c9c   :  { %p4692_p7 = pnand %p4690_p6, %p4687_p5 }
0x1c9e   :  { %4695 = shalt.err (!%p4692_p7)
}
0x1c9f   :  { %s4712_s16 = smov 128   ;;  %s4713_s10 = smov 8   ;;  %v4131_v59 = vld [vmem:[%s5367_s20] ss:$0 sm:$0xff] }
0x1ca0   :  { %4039 = dma.vmem_to_hbm [thread:$0]  %s4034_s18, 256, %s5370_s23, [#allocation3], %s4712_s16, %s4712_s16, %s4713_s10  }
0x1ca1   :  { %v4132_v45 = vld [vmem:[%s5368_s21] ss:$0 sm:$0xff] }
0x1d23   :  { %v3999_v54 = vpop.xlane.xlu0 %3998 }
0x1d24   :  { %v4001_v55 = vmul.f32 0.03125, %v3999_v54  ;;  %v3996_v56 = vpop.xlane.xlu1 %3995 }
0x1d25   :  { %v4000_v11 = vmul.f32 0.03125, %v3996_v56 }
0x1d26   :  { %v4003_v10 = vadd.f32 1e-05, %v4001_v55 }
0x1d27   :  { %v4002_v57 = vadd.f32 1e-05, %v4000_v11 }
0x1d28   :  { %4670 = vrsqrt.f32 %v4003_v10 }
0x1d29   :  { %4672 = vrsqrt.f32 %v4002_v57 }
0x1d32   :  { %v4671_v58 = vpop.eup %4670 }
0x1d33   :  { %v4673_v60 = vpop.eup %4672  ;;  %v4007_v61 = vmul.f32 %v4671_v58, %v3991_v49 }
0x1d34   :  { %v4006_v17 = vmul.f32 %v4673_v60, %v3990_v50 }
0x1d35   :  { %v4015_v62 = vmul.f32 %v4131_v59, %v4007_v61 }
0x1d36   :  { %v4014_v63 = vmul.f32 %v4131_v59, %v4006_v17 }
0x1d37   :  { %v4023_v0 = vadd.f32 %v4132_v45, %v4015_v62 }
0x1d38   :  { %v4022_v1 = vadd.f32 %v4132_v45, %v4014_v63 }
0x1d39   :  { %4025 = vst.msk [vmem:[%s5369_s22 + $0x8] sm:$0xff] %vm89_vm0, %v4023_v0 }
0x1d3a   :  { %4024 = vst.msk [vmem:[%s5369_s22] sm:$0xff] %vm89_vm0, %v4022_v1 }
0x1d3b   :  { %4696 = dma.done.wait [#allocation3], 256  }
0x1d3c   :  { %4697 = vsyncadd [#allocation3], 4294967040 }
0x1d3d   :  { %4045 = vsyncpa [#allocation3], 1 }

</bundles_post_ra>
